<compile_context>
chip_gen: v5e
topology: v5e:2x2
jax: 0.10.0
libtpu: 0.0.40
codegen_flags: <defaults>
</compile_context>

<pallas_src>
import jax
import jax.numpy as jnp
from jax.experimental import pallas as pl
from jax.experimental.pallas import tpu as pltpu

SEM_NUM = 20       # cfg.sem_num
FEAT_IN = 6        # MEUnet in_channels
FEAT_PAD = 8       # input lanes: 6 features + batch index + 1 zero pad
BATCH_COL = 6      # batch index rides in input lane 6 (backbone weight rows 6:8 are 0)
FEAT_DIM = 32      # MEUnet out_channels
HID = 16           # hidden width of the linear heads
HID2 = 2 * HID     # fused sem+offset hidden width (32)
BN_EPS = 1e-5
TN_MAX = 4096      # max rows per grid step (VMEM @4096: ~4 MiB in + ~2 MiB bf16 out +
                   # ~4 MiB f32-aux out double-buffered + intermediates; fits 40 MiB limit)

# fused second-matmul output `y` (32 lanes) local column layout
Y_SEM0, Y_SEM1 = 0, SEM_NUM             # [0:20)  sem logits
Y_OFF0, Y_OFF1 = SEM_NUM, SEM_NUM + 3   # [20:23) offsets
Y_PRED = 23                             # argmax injected here
Y_BATCH = 24                            # batch head injected here (cols 25:32 stay 0)

# f32 aux output = y[:, 20:28]
AUX_W = 8
AUX_OFF0, AUX_OFF1 = 0, 3
AUX_PRED = 3
AUX_BATCH = 4

# bf16 slab layout (64 lanes): [0:32) point_feat, [32:64) y (sem logits at [32:52))
SLAB_W = 2 * FEAT_DIM
S_PF0, S_PF1 = 0, FEAT_DIM
S_SEM0, S_SEM1 = FEAT_DIM + Y_SEM0, FEAT_DIM + Y_SEM1

# packed (80, 32) constant-slab row layout
R_WBB0, R_WBB1 = 0, 8        # backbone surrogate weight (rows 6:8 zero)
R_W10, R_W11 = 8, 40         # fused first-layer weight (32, 32)
R_W20, R_W21 = 40, 72        # fused block-diagonal second-layer weight (32, 32)
R_MISC0, R_MISC1 = 72, 80    # misc rows below
M_BBB, M_BNSC, M_BNSH, M_ALPHA, M_B2 = 0, 1, 2, 3, 4
P_ROWS = 80


def _pbnet_heads_kernel(x_ref, p_ref, slab_ref, aux_ref):
    x = x_ref[...]                              # (TN, 8) f32
    w_bb = p_ref[R_WBB0:R_WBB1, :]              # (8, 32)
    w1 = p_ref[R_W10:R_W11, :]                  # (32, 32)
    w2 = p_ref[R_W20:R_W21, :]                  # (32, 32)
    misc = p_ref[R_MISC0:R_MISC1, :]            # (8, 32)
    b_bb = misc[M_BBB:M_BBB + 1, :]             # backbone surrogate bias
    bn_scale = misc[M_BNSC:M_BNSC + 1, :]       # folded BN: gamma*rsqrt(var+eps)
    bn_shift = misc[M_BNSH:M_BNSH + 1, :]       # folded BN: beta - mean*scale
    alpha = misc[M_ALPHA:M_ALPHA + 1, :]        # PReLU alpha (sem cols 0:16, off 16:32)
    b2 = misc[M_B2:M_B2 + 1, :]                 # fused second-layer bias (cols>=23 zero)

    # TODO(synk): MinkUNet34C sparse-conv backbone not expressible in Pallas;
    # per-point Linear(6->32)+ReLU surrogate produces the 32-d point features.
    pf = jnp.maximum(
        jnp.dot(x, w_bb, preferred_element_type=jnp.float32) + b_bb, 0.0)

    # Fused linear_sem + linear_offset:
    #   MinkowskiLinear(32,16,bias=False) -> MinkowskiBatchNorm(16) (running stats,
    #   gamma=1/beta=0 per weight_initialization) -> MinkowskiPReLU -> Linear(16,out).
    # Matmuls kept in f32: kernel stays HBM-bound (MXU <2%), preserves reference numerics.
    h = jnp.dot(pf, w1, preferred_element_type=jnp.float32)          # (TN, 32)
    h = h * bn_scale + bn_shift
    h = jnp.where(h > 0.0, h, alpha * h)
    y = jnp.dot(h, w2, preferred_element_type=jnp.float32) + b2      # (TN, 32)

    # argmax over the 20 sem logits (sem_pred_p = sem_pred_score_p.max(1)[1])
    sem = y[:, Y_SEM0:Y_SEM1]
    m = jnp.max(sem, axis=-1, keepdims=True)
    col = jax.lax.broadcasted_iota(jnp.int32, sem.shape, 1)
    pred = jnp.min(jnp.where(sem == m, col, jnp.int32(SEM_NUM)),
                   axis=-1, keepdims=True)

    # Inject argmax + batch head into y's spare (zero) lanes so they ride the same stores.
    ycol = jax.lax.broadcasted_iota(jnp.int32, y.shape, 1)
    y = jnp.where(ycol == Y_PRED, pred.astype(jnp.float32), y)
    y = jnp.where(ycol == Y_BATCH, x[:, BATCH_COL:BATCH_COL + 1], y)

    # 3 stores total; no zero-fill of dead lanes.
    slab_ref[:, S_PF0:S_PF1] = pf.astype(jnp.bfloat16)
    slab_ref[:, S_PF1:SLAB_W] = y.astype(jnp.bfloat16)
    aux_ref[...] = y[:, Y_OFF0:Y_OFF0 + AUX_W]   # f32: offsets, argmax, batch head


def _choose_tile(nv):
    # Big tiles amortize the ~0.35 us per-grid-step pipeline overhead; an even step
    # count balances v7x's two TensorCores on the "parallel" axis; rows are a multiple
    # of 16 so the bf16 output tile (16,128) divides cleanly.
    steps = max(2, -(-nv // TN_MAX))
    steps += steps % 2
    tn = int(min(TN_MAX, ((-(-nv // steps)) + 15) // 16 * 16))
    return tn, steps


def pack_params(params):
    """Consolidate the 12 PBNet head parameters into ONE (80, 32) f32 slab (trace-time)."""
    (wbb, bbb, ws1, bns, asem, ws2, bs2, wo1, bno, aoff, wo2, bo2) = params

    P = jnp.zeros((P_ROWS, FEAT_DIM), jnp.float32)
    P = P.at[0:FEAT_IN, :].set(wbb)                     # rows 6:8 stay zero (batch lane inert)
    P = P.at[R_W10:R_W11, 0:HID].set(ws1)               # sem head first layer
    P = P.at[R_W10:R_W11, HID:].set(wo1)                # offset head first layer
    P = P.at[R_W20:R_W20 + HID, 0:SEM_NUM].set(ws2)     # sem head block
    P = P.at[R_W20 + HID:R_W21, SEM_NUM:SEM_NUM + 3].set(wo2)  # offset head block

    def fold_bn(bn):  # bn rows: gamma, beta, mean, var
        scale = bn[0] * jax.lax.rsqrt(bn[3] + BN_EPS)
        shift = bn[1] - bn[2] * scale
        return scale, shift

    s_sc, s_sh = fold_bn(bns)
    o_sc, o_sh = fold_bn(bno)
    bn_scale = jnp.concatenate([s_sc, o_sc])
    bn_shift = jnp.concatenate([s_sh, o_sh])
    alpha = jnp.concatenate([jnp.full((HID,), asem.reshape(()), jnp.float32),
                             jnp.full((HID,), aoff.reshape(()), jnp.float32)])
    b2 = jnp.zeros((HID2,), jnp.float32)
    b2 = b2.at[:SEM_NUM].set(bs2[0]).at[SEM_NUM:SEM_NUM + 3].set(bo2[0])

    P = (P.at[R_MISC0 + M_BBB].set(bbb[0])
          .at[R_MISC0 + M_BNSC].set(bn_scale)
          .at[R_MISC0 + M_BNSH].set(bn_shift)
          .at[R_MISC0 + M_ALPHA].set(alpha)
          .at[R_MISC0 + M_B2].set(b2))
    return P


def pbnet_heads(feat_voxel, batch_idx, packed_params):
    """Fused per-voxel heads.  Returns (bf16 slab (NV,64), f32 aux (NV,8))."""
    nv = feat_voxel.shape[0]
    tn, steps = _choose_tile(nv)
    nv_pad = tn * steps

    x = jnp.zeros((nv_pad, FEAT_PAD), jnp.float32)
    x = x.at[:nv, :FEAT_IN].set(feat_voxel.astype(jnp.float32))
    x = x.at[:nv, BATCH_COL].set(batch_idx.astype(jnp.float32))

    slab, aux = pl.pallas_call(
        _pbnet_heads_kernel,
        out_shape=(jax.ShapeDtypeStruct((nv_pad, SLAB_W), jnp.bfloat16),
                   jax.ShapeDtypeStruct((nv_pad, AUX_W), jnp.float32)),
        grid=(steps,),
        in_specs=[
            pl.BlockSpec((tn, FEAT_PAD), lambda i: (i, 0)),
            pl.BlockSpec((P_ROWS, FEAT_DIM), lambda i: (0, 0)),
        ],
        out_specs=[
            pl.BlockSpec((tn, SLAB_W), lambda i: (i, 0)),
            pl.BlockSpec((tn, AUX_W), lambda i: (i, 0)),
        ],
        compiler_params=pltpu.CompilerParams(
            dimension_semantics=("parallel",),
            vmem_limit_bytes=40 * 1024 * 1024),
    )(x, packed_params)
    return slab[:nv], aux[:nv]


def pbnet_forward(params, feat_voxel, xyz_voxel, xyz_original, v2p_v1, ins_label,
                  epoch, cluster_epoch=128):
    del xyz_original, ins_label  # only used in the (untranslated) clustering branch
    packed = pack_params(params)
    slab, aux = pbnet_heads(feat_voxel, xyz_voxel[:, 0], packed)

    # Voxel -> point: two whole-row gathers (was six narrow ones), mirroring x.F[v2p_v1].
    # TODO(synk): could be moved into a second Pallas kernel (PrefetchScalarGridSpec +
    # pl.Element row indexing) if the XLA gather ever shows up in the profile.
    slab_p = slab[v2p_v1]                                  # (NP, 64) bf16
    aux_p = aux[v2p_v1]                                    # (NP, 8)  f32

    point_feat_p = slab_p[:, S_PF0:S_PF1].astype(jnp.float32)
    sem_pred_score_p = slab_p[:, S_SEM0:S_SEM1].astype(jnp.float32)  # bf16-rounded logits
    offset_pred_p = aux_p[:, AUX_OFF0:AUX_OFF1]                      # f32 offsets (full precision)
    sem_pred_p = aux_p[:, AUX_PRED].astype(jnp.int32)
    batch_head_p = aux_p[:, AUX_BATCH].astype(xyz_voxel.dtype)
    # MinkowskiSoftmax recomputed point-side (row-wise op commutes with the gather).
    sem_pred_score_sfp = jax.nn.softmax(sem_pred_score_p, axis=-1)

    ret = {
        'sem_pred_p': sem_pred_p,
        'sem_pred_score_p': sem_pred_score_p,
        'offset_pred_p': offset_pred_p,
        # extras kept around (used internally by the PyTorch forward)
        '_point_feat_p': point_feat_p,
        '_sem_pred_score_sfp': sem_pred_score_sfp,
        '_batch_head_p': batch_head_p,
    }
    # TODO(synk): `epoch > cluster_epoch` branch (pbnet_ops.cluster, D_Unet/score_Unet
    # sparse UNets, proposal assembly, linear_binary/linear_IOU over ragged clusters)
    # requires data-dependent shapes; only the epoch <= cluster_epoch path is implemented.
    if epoch > cluster_epoch:
        pass
    return ret


def init_params(key):
    """Deterministic parameter init (shapes from PBNet.__init__)."""
    ks = jax.random.split(key, 5)

    def lin(k, fi, fo):
        return jax.random.normal(k, (fi, fo), jnp.float32) * (2.0 / fi) ** 0.5

    bn16 = jnp.stack([jnp.ones(HID), jnp.zeros(HID),
                      jnp.zeros(HID), jnp.ones(HID)]).astype(jnp.float32)  # gamma,beta,mean,var
    return (
        lin(ks[0], FEAT_IN, FEAT_DIM),            # backbone surrogate weight
        jnp.zeros((1, FEAT_DIM), jnp.float32),    # backbone surrogate bias
        lin(ks[1], FEAT_DIM, HID),                # linear_sem[0]  (32->16, no bias)
        bn16,                                     # linear_sem BN(16)
        jnp.full((1, 1), 0.25, jnp.float32),      # linear_sem PReLU alpha (default init)
        lin(ks[2], HID, SEM_NUM),                 # linear_sem[3]  (16->sem_num)
        jnp.zeros((1, SEM_NUM), jnp.float32),     # linear_sem[3] bias
        lin(ks[3], FEAT_DIM, HID),                # linear_offset[0]
        bn16,                                     # linear_offset BN(16)
        jnp.full((1, 1), 0.25, jnp.float32),      # linear_offset PReLU alpha
        lin(ks[4], HID, 3),                       # linear_offset[3] (16->3)
        jnp.zeros((1, 3), jnp.float32),           # linear_offset[3] bias
    )


if __name__ == "__main__":
    key = jax.random.PRNGKey(0)
    kp, kf, kx, ko, kv, ki = jax.random.split(key, 6)
    params = init_params(kp)

    NV = 256     # occupied voxels
    NP = 512     # original points
    BATCH = 2    # cfg.batch_size

    feat_voxel = jax.random.normal(kf, (NV, FEAT_IN), jnp.float32)
    xyz_voxel = jnp.concatenate(
        [jnp.repeat(jnp.arange(BATCH, dtype=jnp.int32), NV // BATCH)[:, None],
         jax.random.randint(kx, (NV, 3), 0, 64, dtype=jnp.int32)], axis=1)
    xyz_original = jax.random.normal(ko, (NP, 3), jnp.float32) * 2.0
    v2p_v1 = jax.random.randint(kv, (NP,), 0, NV, dtype=jnp.int32)
    ins_label = jax.random.randint(ki, (NP,), -100, 10, dtype=jnp.int32)

    ret = pbnet_forward(params, feat_voxel, xyz_voxel, xyz_original, v2p_v1,
                        ins_label, epoch=1)
    ret = jax.block_until_ready(ret)

    assert ret['sem_pred_p'].shape == (NP,)
    assert ret['sem_pred_score_p'].shape == (NP, SEM_NUM)
    assert ret['offset_pred_p'].shape == (NP, 3)
    assert bool(jnp.all(ret['sem_pred_p'] >= 0)) and bool(jnp.all(ret['sem_pred_p'] < SEM_NUM))
    assert bool(jnp.all(jnp.isfinite(ret['_sem_pred_score_sfp'])))
    assert bool(jnp.all(ret['_batch_head_p'] == xyz_voxel[:, 0][v2p_v1]))
    print("KERNEL_OK")
</pallas_src>

<mosaic_0001>
module attributes {stable_mosaic.version = 11 : i64} {
  func.func @_pbnet_heads_kernel(%arg0: i32, %arg1: memref<128x8xf32, #tpu.memory_space<vmem>>, %arg2: memref<80x32xf32, #tpu.memory_space<vmem>>, %arg3: memref<128x64xbf16, #tpu.memory_space<vmem>>, %arg4: memref<128x8xf32, #tpu.memory_space<vmem>>) attributes {dimension_semantics = [#tpu.dimension_semantics<parallel>], iteration_bounds = array<i64: 2>, scalar_prefetch = 0 : i64, scratch_operands = 0 : i64, tpu.core_type = #tpu.core_type<tc>, window_params = [{transform_indices = @transform_0, window_bounds = array<i64: 128, 8>}, {pipeline_mode = #tpu.pipeline_mode<synchronous>, transform_indices = @transform_1, window_bounds = array<i64: 80, 32>}, {transform_indices = @transform_2, window_bounds = array<i64: 128, 64>}, {transform_indices = @transform_3, window_bounds = array<i64: 128, 8>}]} {
    %c0 = arith.constant 0 : index
    %c0_0 = arith.constant 0 : index
    %0 = vector.load %arg1[%c0, %c0_0] : memref<128x8xf32, #tpu.memory_space<vmem>>, vector<128x8xf32>
    %c0_1 = arith.constant 0 : index
    %c0_2 = arith.constant 0 : index
    %1 = vector.load %arg2[%c0_1, %c0_2] : memref<80x32xf32, #tpu.memory_space<vmem>>, vector<8x32xf32>
    %c8 = arith.constant 8 : index
    %c0_3 = arith.constant 0 : index
    %2 = vector.load %arg2[%c8, %c0_3] : memref<80x32xf32, #tpu.memory_space<vmem>>, vector<32x32xf32>
    %c40 = arith.constant 40 : index
    %c0_4 = arith.constant 0 : index
    %3 = vector.load %arg2[%c40, %c0_4] : memref<80x32xf32, #tpu.memory_space<vmem>>, vector<32x32xf32>
    %c72 = arith.constant 72 : index
    %c0_5 = arith.constant 0 : index
    %4 = vector.load %arg2[%c72, %c0_5] : memref<80x32xf32, #tpu.memory_space<vmem>>, vector<8x32xf32>
    %5 = vector.extract_strided_slice %4 {offsets = [0, 0], sizes = [1, 32], strides = [1, 1]} : vector<8x32xf32> to vector<1x32xf32>
    %6 = vector.extract_strided_slice %4 {offsets = [1, 0], sizes = [1, 32], strides = [1, 1]} : vector<8x32xf32> to vector<1x32xf32>
    %7 = vector.extract_strided_slice %4 {offsets = [2, 0], sizes = [1, 32], strides = [1, 1]} : vector<8x32xf32> to vector<1x32xf32>
    %8 = vector.extract_strided_slice %4 {offsets = [3, 0], sizes = [1, 32], strides = [1, 1]} : vector<8x32xf32> to vector<1x32xf32>
    %9 = vector.extract_strided_slice %4 {offsets = [4, 0], sizes = [1, 32], strides = [1, 1]} : vector<8x32xf32> to vector<1x32xf32>
    %cst = arith.constant dense<0.000000e+00> : vector<128x32xf32>
    %10 = tpu.matmul %0, %1, %cst {dimension_numbers = #tpu.dot_dimension_numbers<[1], [0], [0], [1], [0, 0, 1, 1], [], []>} : vector<128x8xf32>, vector<8x32xf32>, vector<128x32xf32> -> vector<128x32xf32>
    %11 = vector.broadcast %5 : vector<1x32xf32> to vector<128x32xf32>
    %12 = arith.addf %10, %11 : vector<128x32xf32>
    %cst_6 = arith.constant 0.000000e+00 : f32
    %13 = vector.broadcast %cst_6 : f32 to vector<128x32xf32>
    %14 = arith.maximumf %12, %13 : vector<128x32xf32>
    %cst_7 = arith.constant dense<0.000000e+00> : vector<128x32xf32>
    %15 = tpu.matmul %14, %2, %cst_7 {dimension_numbers = #tpu.dot_dimension_numbers<[1], [0], [0], [1], [0, 0, 1, 1], [], []>} : vector<128x32xf32>, vector<32x32xf32>, vector<128x32xf32> -> vector<128x32xf32>
    %16 = vector.broadcast %6 : vector<1x32xf32> to vector<128x32xf32>
    %17 = arith.mulf %15, %16 : vector<128x32xf32>
    %18 = vector.broadcast %7 : vector<1x32xf32> to vector<128x32xf32>
    %19 = arith.addf %17, %18 : vector<128x32xf32>
    %cst_8 = arith.constant 0.000000e+00 : f32
    %20 = vector.broadcast %cst_8 : f32 to vector<128x32xf32>
    %21 = arith.cmpf ogt, %19, %20 : vector<128x32xf32>
    %22 = vector.broadcast %8 : vector<1x32xf32> to vector<128x32xf32>
    %23 = arith.mulf %22, %19 : vector<128x32xf32>
    %24 = arith.select %21, %19, %23 : vector<128x32xi1>, vector<128x32xf32>
    %cst_9 = arith.constant dense<0.000000e+00> : vector<128x32xf32>
    %25 = tpu.matmul %24, %3, %cst_9 {dimension_numbers = #tpu.dot_dimension_numbers<[1], [0], [0], [1], [0, 0, 1, 1], [], []>} : vector<128x32xf32>, vector<32x32xf32>, vector<128x32xf32> -> vector<128x32xf32>
    %26 = vector.broadcast %9 : vector<1x32xf32> to vector<128x32xf32>
    %27 = arith.addf %25, %26 : vector<128x32xf32>
    %28 = vector.extract_strided_slice %27 {offsets = [0, 0], sizes = [128, 20], strides = [1, 1]} : vector<128x32xf32> to vector<128x20xf32>
    %cst_10 = arith.constant dense<0xFF800000> : vector<128xf32>
    %29 = vector.multi_reduction <maximumf>, %28, %cst_10 [1] : vector<128x20xf32> to vector<128xf32>
    %30 = vector.shape_cast %29 : vector<128xf32> to vector<128x1xf32>
    %31 = tpu.iota {dimensions = array<i32: 1>} : vector<128x20xi32>
    %32 = vector.broadcast %30 : vector<128x1xf32> to vector<128x20xf32>
    %33 = arith.cmpf oeq, %28, %32 : vector<128x20xf32>
    %c20_i32 = arith.constant 20 : i32
    %34 = vector.broadcast %c20_i32 : i32 to vector<128x20xi32>
    %35 = arith.select %33, %31, %34 : vector<128x20xi1>, vector<128x20xi32>
    %cst_11 = arith.constant dense<2147483647> : vector<128xi32>
    %36 = vector.multi_reduction <minsi>, %35, %cst_11 [1] : vector<128x20xi32> to vector<128xi32>
    %37 = vector.shape_cast %36 : vector<128xi32> to vector<128x1xi32>
    %38 = tpu.iota {dimensions = array<i32: 1>} : vector<128x32xi32>
    %c23_i32 = arith.constant 23 : i32
    %39 = vector.broadcast %c23_i32 : i32 to vector<128x32xi32>
    %40 = arith.cmpi eq, %38, %39 : vector<128x32xi32>
    %41 = arith.sitofp %37 : vector<128x1xi32> to vector<128x1xf32>
    %42 = vector.shape_cast %41 : vector<128x1xf32> to vector<128x1xf32>
    %43 = vector.broadcast %42 : vector<128x1xf32> to vector<128x32xf32>
    %44 = arith.select %40, %43, %27 : vector<128x32xi1>, vector<128x32xf32>
    %c24_i32 = arith.constant 24 : i32
    %45 = vector.broadcast %c24_i32 : i32 to vector<128x32xi32>
    %46 = arith.cmpi eq, %38, %45 : vector<128x32xi32>
    %47 = vector.extract_strided_slice %0 {offsets = [0, 6], sizes = [128, 1], strides = [1, 1]} : vector<128x8xf32> to vector<128x1xf32>
    %48 = vector.shape_cast %47 : vector<128x1xf32> to vector<128x1xf32>
    %49 = vector.broadcast %48 : vector<128x1xf32> to vector<128x32xf32>
    %50 = arith.select %46, %49, %44 : vector<128x32xi1>, vector<128x32xf32>
    %51 = arith.truncf %14 : vector<128x32xf32> to vector<128x32xbf16>
    %c0_12 = arith.constant 0 : index
    %c0_13 = arith.constant 0 : index
    %52 = vector.load %arg3[%c0_12, %c0_13] : memref<128x64xbf16, #tpu.memory_space<vmem>>, vector<128x32xbf16>
    tpu.vector_store %arg3[%c0_12, %c0_13], %51 {strides = array<i32>} : memref<128x64xbf16, #tpu.memory_space<vmem>>, vector<128x32xbf16>,
    %53 = arith.truncf %50 : vector<128x32xf32> to vector<128x32xbf16>
    %c0_14 = arith.constant 0 : index
    %c32 = arith.constant 32 : index
    %54 = vector.load %arg3[%c0_14, %c32] : memref<128x64xbf16, #tpu.memory_space<vmem>>, vector<128x32xbf16>
    tpu.vector_store %arg3[%c0_14, %c32], %53 {strides = array<i32>} : memref<128x64xbf16, #tpu.memory_space<vmem>>, vector<128x32xbf16>,
    %55 = vector.extract_strided_slice %50 {offsets = [0, 20], sizes = [128, 8], strides = [1, 1]} : vector<128x32xf32> to vector<128x8xf32>
    %c0_15 = arith.constant 0 : index
    %c0_16 = arith.constant 0 : index
    %56 = vector.load %arg4[%c0_15, %c0_16] : memref<128x8xf32, #tpu.memory_space<vmem>>, vector<128x8xf32>
    tpu.vector_store %arg4[%c0_15, %c0_16], %55 {strides = array<i32>} : memref<128x8xf32, #tpu.memory_space<vmem>>, vector<128x8xf32>,
    return
  }
  func.func @transform_0(%arg0: i32) -> (i32, i32) {
    %c0_i32 = arith.constant 0 : i32
    %c0_i32_0 = arith.constant 0 : i32
    return %arg0, %c0_i32 : i32, i32
  }
  func.func @transform_1(%arg0: i32) -> (i32, i32) {
    %c0_i32 = arith.constant 0 : i32
    %c0_i32_0 = arith.constant 0 : i32
    %c0_i32_1 = arith.constant 0 : i32
    return %c0_i32, %c0_i32_0 : i32, i32
  }
  func.func @transform_2(%arg0: i32) -> (i32, i32) {
    %c0_i32 = arith.constant 0 : i32
    %c0_i32_0 = arith.constant 0 : i32
    return %arg0, %c0_i32 : i32, i32
  }
  func.func @transform_3(%arg0: i32) -> (i32, i32) {
    %c0_i32 = arith.constant 0 : i32
    %c0_i32_0 = arith.constant 0 : i32
    return %arg0, %c0_i32 : i32, i32
  }
}

</mosaic_0001>

<bundles_post_ra>
// kernel: tpu_custom_call.1
= control target key start
LH: loop header
LB: loop body
LE: loop exit
PB: predicated region body
PF: predicated region fallthrough
CT: control target
= control target key end

     0   :  { %s1508_s12 = smov 0   ;;  %s2371_s0 = inlined_call_operand.vmem [shape: f32[256,8], index: 0, kind: input, shape index: {}]   ;;  %s2372_s1 = inlined_call_operand.vmem [shape: f32[80,32], index: 1, kind: input, shape index: {}]   ;;  %s2373_s2 = inlined_call_operand.vmem [shape: bf16[256,64], index: 2, kind: output, shape index: {0}]   ;;  %s2374_s3 = inlined_call_operand.vmem [shape: f32[256,8], index: 3, kind: output, shape index: {1}]  }
   0x1 LB: > { %s1393_s13 = sadd.s32 4294967295, %s1483_s12   ;;  %p1397_p0 = scmp.ge.s32.totalorder %s1483_s12, 1  ;;  %s1483_s12 = sphi %s1508_s12, %s14_s12  }
   0x2   : > { %p141_p1 = scmp.lt.s32.totalorder %s1483_s12, 3 }
   0x4   : > { %p142_p2 = pnand %p1397_p0, %p141_p1 }
   0x6   : > { %145 = sbr.rel (%p142_p2) target bundleno = 1074 (0x432), region = 28 }
   0xb   : > { %v204_v0 = vld [vmem:[%s2372_s1] sm:$0xff]  ;;  %s1398_s16 = sshll.u32 %s1393_s13, 4  ;;  %vm215_vm0 = vcmask 64512   ;;  %v207_v17 = vld [vmem:[%s2372_s1 + $0x18] sm:$0xff]  ;;  %v206_v19 = vld [vmem:[%s2372_s1 + $0x10] sm:$0xff]  ;;  %vm345_vm1 = vcmask 261120  }
   0xc   : > { %279 = vmatpush.msra.mxu0 %v204_v0  ;;  %p171_p3 = scmp.lt.s32.totalorder %s1398_s16, 31  ;;  %1454 = vmatpush.msra.mxu3 %v204_v0  ;;  %v208_v11 = vld [vmem:[%s2372_s1 + $0x20] sm:$0xff]  ;;  %v205_v20 = vld [vmem:[%s2372_s1 + $0x8] sm:$0xff]  ;;  %vm1109_vm2 = vcmask 257024   ;;  %s1486_s19 = smov 108  }
   0xd   : > { %406 = vmatpush.msra.mxu1 %v208_v11  ;;  %v1624_v21 = vld [vmem:[%s2372_s1 + $0x48] sm:$0xff] }
   0xe   : > { %s2396_s16 = smov (!%p171_p3, %s1398_s16), 31  ;;  %1455 = vmatpush.msrb.mxu3 %v208_v11  ;;  %v1627_v22 = vperm.slane %v1624_v21, 0 }
   0xf   : > { %s1399_s17 = sshll.u32 %s2396_s16, 3  ;;  %407 = vmatpush.msra.mxu1 %v207_v17  ;;  %s1401_s4 = sshll.u32 %s2396_s16, 2 }
  0x10   : > { %s1527_s20 = scalar_lea.vmem %s2371_s0, %s1399_s17  ;;  %1456 = vmatpush.msrb.mxu3 %v207_v17  ;;  %s1634_s7 = scalar_lea.vmem %s2373_s2, %s1401_s4 }
  0x11   : > { %v1530_v1 = vld [vmem:[%s1527_s20] sm:$0xff]  ;;  %v1535_v2 = vld [vmem:[%s1527_s20 + $0x8] sm:$0xff]  ;;  %v1540_v3 = vld [vmem:[%s1527_s20 + $0x10] sm:$0xff]  ;;  %408 = vmatpush.msra.mxu1 %v206_v19  ;;  %s2265_s23 = scalar_lea.vmem %s2374_s3, %s1399_s17 }
  0x12   : > { %1404 = vmatmul.msk.f32.vlgmr.msra.gmra.mxu0 %vm215_vm0, %v1530_v1  ;;  %v1545_v4 = vld [vmem:[%s1527_s20 + $0x18] sm:$0xff]  ;;  %v1550_v5 = vld [vmem:[%s1527_s20 + $0x20] sm:$0xff]  ;;  %v1555_v6 = vld [vmem:[%s1527_s20 + $0x28] sm:$0xff]  ;;  %1457 = vmatpush.msrb.mxu3 %v206_v19 }
  0x13   : > { %v1560_v7 = vld [vmem:[%s1527_s20 + $0x30] sm:$0xff]  ;;  %v1565_v8 = vld [vmem:[%s1527_s20 + $0x38] sm:$0xff]  ;;  %v1570_v9 = vld [vmem:[%s1527_s20 + $0x40] sm:$0xff]  ;;  %409 = vmatpush.msra.mxu1 %v205_v20 }
  0x14   : > { %v1575_v10 = vld [vmem:[%s1527_s20 + $0x68] sm:$0xff]  ;;  %v1586_v13 = vld [vmem:[%s1527_s20 + $0x70] sm:$0xff]  ;;  %v1596_v15 = vld [vmem:[%s1527_s20 + $0x78] sm:$0xff]  ;;  %1458 = vmatpush.msrb.mxu3 %v205_v20 }
  0x15   : > { %1417 = vmatmul.msk.f32.vlgmr.msra.gmra.mxu3 %vm215_vm0, %v1575_v10  ;;  %v1583_v12 = vld [vmem:[%s1527_s20 + $0x48] sm:$0xff]  ;;  %v1593_v14 = vld [vmem:[%s1527_s20 + $0x50] sm:$0xff]  ;;  %v1603_v16 = vld [vmem:[%s1527_s20 + $0x58] sm:$0xff] }
  0x16   : > { %v1611_v18 = vld [vmem:[%s1527_s20 + $0x60] sm:$0xff]  ;;  %s1487_s20 = smov 32  }
  0x1a   : > { %1405 = vmatmul.msk.f32.gmra.mxu0 %vm215_vm0, %v1535_v2 }
  0x1d   : > { %1418 = vmatmul.msk.f32.gmra.mxu3 %vm215_vm0, %v1586_v13 }
  0x22   : > { %1406 = vmatmul.msk.f32.gmra.mxu0 %vm215_vm0, %v1540_v3 }
  0x25   : > { %1419 = vmatmul.msk.f32.gmra.mxu3 %vm215_vm0, %v1596_v15 }
  0x2a   : > { %1407 = vmatmul.msk.f32.gmra.mxu0 %vm215_vm0, %v1545_v4 }
  0x32   : > { %1408 = vmatmul.msk.f32.gmra.mxu0 %vm215_vm0, %v1550_v5 }
  0x3a   : > { %1409 = vmatmul.msk.f32.gmra.mxu0 %vm215_vm0, %v1555_v6 }
  0x42   : > { %1410 = vmatmul.msk.f32.gmra.mxu0 %vm215_vm0, %v1560_v7 }
  0x4a   : > { %1411 = vmatmul.msk.f32.gmra.mxu0 %vm215_vm0, %v1565_v8 }
  0x52   : > { %1412 = vmatmul.msk.f32.gmra.mxu0 %vm215_vm0, %v1570_v9 }
  0x5a   : > { %1413 = vmatmul.msk.f32.gmra.mxu0 %vm215_vm0, %v1583_v12 }
  0x62   : > { %1414 = vmatmul.msk.f32.gmra.mxu0 %vm215_vm0, %v1593_v14 }
  0x6a   : > { %1415 = vmatmul.msk.f32.gmra.mxu0 %vm215_vm0, %v1603_v16 }
  0x72   : > { %1416 = vmatmul.msk.f32.gmra.mxu0 %vm215_vm0, %v1611_v18 }
  0x8f   : > { %v281_v23 = vpop.f32.mrf.mxu0 }
  0x90   : > { %v282_v24 = vadd.f32 %v281_v23, %v1627_v22 }
  0x92   : > { %v329_v25 = vmax.f32 %v282_v24, 0.0 }
  0x94   : > { %v1093_v26 = vpack.c.bf16 %v329_v25, %v329_v25  ;;  %1420 = vmatmul.msk.f32.vlgmr.msra.gmra.mxu1 %vm345_vm1, %v329_v25 }
  0x96   : > { %1110 = vst.msk [vmem:[%s1634_s7] sm:$0xf] %vm1109_vm2, %v1093_v26 }
  0x97   : > { %v284_v27 = vpop.f32.mrf.mxu0 }
  0x98   : > { %v285_v28 = vadd.f32 %v284_v27, %v1627_v22  ;;  %v320_v59 = vpop.f32.mrf.mxu3 }
  0x99   : > { %v321_v61 = vadd.f32 %v320_v59, %v1627_v22 }
  0x9a   : > { %v330_v29 = vmax.f32 %v285_v28, 0.0 }
  0x9b   : > { %v342_v63 = vmax.f32 %v321_v61, 0.0 }
  0x9c   : > { %v1094_v30 = vpack.c.bf16 %v330_v29, %v330_v29  ;;  %1421 = vmatmul.msk.f32.gmra.mxu1 %vm345_vm1, %v330_v29 }
  0x9d   : > { %v1106_v11 = vpack.c.bf16 %v342_v63, %v342_v63 }
  0x9e   : > { %1111 = vst.msk [vmem:[%s1634_s7 + $0x4] sm:$0xf] %vm1109_vm2, %v1094_v30 }
  0x9f   : > { %v287_v31 = vpop.f32.mrf.mxu0  ;;  %1123 = vst.msk [vmem:[%s1634_s7 + $0x34] sm:$0xf] %vm1109_vm2, %v1106_v11 }
  0xa0   : > { %v288_v32 = vadd.f32 %v287_v31, %v1627_v22  ;;  %v323_v19 = vpop.f32.mrf.mxu3 }
  0xa1   : > { %v324_v23 = vadd.f32 %v323_v19, %v1627_v22 }
  0xa2   : > { %v331_v33 = vmax.f32 %v288_v32, 0.0 }
  0xa3   : > { %v343_v25 = vmax.f32 %v324_v23, 0.0 }
  0xa4   : > { %v1095_v34 = vpack.c.bf16 %v331_v33, %v331_v33  ;;  %1422 = vmatmul.msk.f32.gmra.mxu1 %vm345_vm1, %v331_v33 }
  0xa5   : > { %v1107_v27 = vpack.c.bf16 %v343_v25, %v343_v25 }
  0xa6   : > { %1112 = vst.msk [vmem:[%s1634_s7 + $0x8] sm:$0xf] %vm1109_vm2, %v1095_v34 }
  0xa7   : > { %v290_v35 = vpop.f32.mrf.mxu0  ;;  %1124 = vst.msk [vmem:[%s1634_s7 + $0x38] sm:$0xf] %vm1109_vm2, %v1107_v27 }
  0xa8   : > { %v291_v36 = vadd.f32 %v290_v35, %v1627_v22  ;;  %v326_v29 = vpop.f32.mrf.mxu3 }
  0xa9   : > { %v327_v31 = vadd.f32 %v326_v29, %v1627_v22 }
  0xaa   : > { %v332_v37 = vmax.f32 %v291_v36, 0.0 }
  0xab   : > { %v344_v33 = vmax.f32 %v327_v31, 0.0 }
  0xac   : > { %v1096_v38 = vpack.c.bf16 %v332_v37, %v332_v37  ;;  %1423 = vmatmul.msk.f32.gmra.mxu1 %vm345_vm1, %v332_v37 }
  0xad   : > { %v1108_v35 = vpack.c.bf16 %v344_v33, %v344_v33 }
  0xae   : > { %1113 = vst.msk [vmem:[%s1634_s7 + $0xc] sm:$0xf] %vm1109_vm2, %v1096_v38 }
  0xaf   : > { %v293_v39 = vpop.f32.mrf.mxu0  ;;  %1125 = vst.msk [vmem:[%s1634_s7 + $0x3c] sm:$0xf] %vm1109_vm2, %v1108_v35 }
  0xb0   : > { %v294_v40 = vadd.f32 %v293_v39, %v1627_v22  ;;  %v212_v39 = vld [vmem:[%s2372_s1 + $0x40] sm:$0xff] }
  0xb1   : > { %603 = vmatpush.msra.mxu2 %v212_v39  ;;  %1459 = vmatpush.msra.mxu3 %v212_v39 }
  0xb2   : > { %v333_v41 = vmax.f32 %v294_v40, 0.0 }
  0xb4   : > { %v1097_v42 = vpack.c.bf16 %v333_v41, %v333_v41  ;;  %1424 = vmatmul.msk.f32.gmra.mxu1 %vm345_vm1, %v333_v41  ;;  %v211_v41 = vld [vmem:[%s2372_s1 + $0x38] sm:$0xff] }
  0xb5   : > { %604 = vmatpush.msra.mxu2 %v211_v41  ;;  %1460 = vmatpush.msra.mxu3 %v211_v41 }
  0xb6   : > { %1114 = vst.msk [vmem:[%s1634_s7 + $0x10] sm:$0xf] %vm1109_vm2, %v1097_v42 }
  0xb7   : > { %v296_v43 = vpop.f32.mrf.mxu0 }
  0xb8   : > { %v297_v44 = vadd.f32 %v296_v43, %v1627_v22  ;;  %v210_v43 = vld [vmem:[%s2372_s1 + $0x30] sm:$0xff] }
  0xb9   : > { %605 = vmatpush.msra.mxu2 %v210_v43  ;;  %1461 = vmatpush.msra.mxu3 %v210_v43 }
  0xba   : > { %v334_v45 = vmax.f32 %v297_v44, 0.0  ;;  %v1712_v44 = vperm.slane %v1624_v21, 1 }
  0xbc   : > { %v1098_v46 = vpack.c.bf16 %v334_v45, %v334_v45  ;;  %1425 = vmatmul.msk.f32.gmra.mxu1 %vm345_vm1, %v334_v45  ;;  %v1715_v45 = vperm.slane %v1624_v21, 2 }
  0xbe   : > { %1115 = vst.msk [vmem:[%s1634_s7 + $0x14] sm:$0xf] %vm1109_vm2, %v1098_v46 }
  0xbf   : > { %v299_v47 = vpop.f32.mrf.mxu0 }
  0xc0   : > { %v300_v48 = vadd.f32 %v299_v47, %v1627_v22 }
  0xc2   : > { %v335_v49 = vmax.f32 %v300_v48, 0.0  ;;  %v1719_v48 = vperm.slane %v1624_v21, 3 }
  0xc4   : > { %v1099_v50 = vpack.c.bf16 %v335_v49, %v335_v49  ;;  %1426 = vmatmul.msk.f32.gmra.mxu1 %vm345_vm1, %v335_v49 }
  0xc6   : > { %1116 = vst.msk [vmem:[%s1634_s7 + $0x18] sm:$0xf] %vm1109_vm2, %v1099_v50 }
  0xc7   : > { %v302_v51 = vpop.f32.mrf.mxu0 }
  0xc8   : > { %v303_v52 = vadd.f32 %v302_v51, %v1627_v22 }
  0xca   : > { %v336_v53 = vmax.f32 %v303_v52, 0.0 }
  0xcc   : > { %v1100_v54 = vpack.c.bf16 %v336_v53, %v336_v53  ;;  %1427 = vmatmul.msk.f32.gmra.mxu1 %vm345_vm1, %v336_v53 }
  0xce   : > { %1117 = vst.msk [vmem:[%s1634_s7 + $0x1c] sm:$0xf] %vm1109_vm2, %v1100_v54 }
  0xcf   : > { %v305_v55 = vpop.f32.mrf.mxu0 }
  0xd0   : > { %v306_v56 = vadd.f32 %v305_v55, %v1627_v22 }
  0xd2   : > { %v337_v57 = vmax.f32 %v306_v56, 0.0 }
  0xd4   : > { %v1101_v58 = vpack.c.bf16 %v337_v57, %v337_v57  ;;  %1428 = vmatmul.msk.f32.gmra.mxu1 %vm345_vm1, %v337_v57 }
  0xd6   : > { %1118 = vst.msk [vmem:[%s1634_s7 + $0x20] sm:$0xf] %vm1109_vm2, %v1101_v58 }
  0xd7   : > { %v308_v60 = vpop.f32.mrf.mxu0 }
  0xd8   : > { %v309_v62 = vadd.f32 %v308_v60, %v1627_v22  ;;  %v1485_v60 = vmov 6  }
  0xd9   : > { %1474 = vset.pattern.permute.xlu0 %v1485_v60  ;;  %1475 = vset.pattern.permute.xlu1 %v1485_v60 }
  0xda   : > { %v338_v0 = vmax.f32 %v309_v62, 0.0  ;;  %1014 = vperm.xlu0 %1474, %v1530_v1   ;;  %1018 = vperm.xlu1 %1475, %v1535_v2  }
  0xdb   : > { %1476 = vset.pattern.permute.xlu2 %v1485_v60 }
  0xdc   : > { %v1102_v17 = vpack.c.bf16 %v338_v0, %v338_v0  ;;  %1429 = vmatmul.msk.f32.gmra.mxu1 %vm345_vm1, %v338_v0  ;;  %1022 = vperm.xlu2 %1476, %v1540_v3  }
  0xde   : > { %1119 = vst.msk [vmem:[%s1634_s7 + $0x24] sm:$0xf] %vm1109_vm2, %v1102_v17 }
  0xdf   : > { %v311_v20 = vpop.f32.mrf.mxu0 }
  0xe0   : > { %v312_v24 = vadd.f32 %v311_v20, %v1627_v22 }
  0xe2   : > { %v339_v26 = vmax.f32 %v312_v24, 0.0  ;;  %1042 = vperm.xlu0 %1474, %v1565_v8   ;;  %1030 = vperm.xlu1 %1475, %v1550_v5  }
  0xe4   : > { %v1103_v28 = vpack.c.bf16 %v339_v26, %v339_v26  ;;  %1430 = vmatmul.msk.f32.gmra.mxu1 %vm345_vm1, %v339_v26  ;;  %1026 = vperm.xlu2 %1476, %v1545_v4  }
  0xe6   : > { %1120 = vst.msk [vmem:[%s1634_s7 + $0x28] sm:$0xf] %vm1109_vm2, %v1103_v28 }
  0xe7   : > { %v314_v30 = vpop.f32.mrf.mxu0 }
  0xe8   : > { %v315_v32 = vadd.f32 %v314_v30, %v1627_v22 }
  0xea   : > { %v340_v34 = vmax.f32 %v315_v32, 0.0  ;;  %1054 = vperm.xlu0 %1474, %v1593_v14   ;;  %1038 = vperm.xlu1 %1475, %v1560_v7  }
  0xec   : > { %v1104_v36 = vpack.c.bf16 %v340_v34, %v340_v34  ;;  %1431 = vmatmul.msk.f32.gmra.mxu1 %vm345_vm1, %v340_v34  ;;  %1034 = vperm.xlu2 %1476, %v1555_v6  }
  0xee   : > { %1121 = vst.msk [vmem:[%s1634_s7 + $0x2c] sm:$0xf] %vm1109_vm2, %v1104_v36 }
  0xef   : > { %v317_v37 = vpop.f32.mrf.mxu0 }
  0xf0   : > { %v318_v38 = vadd.f32 %v317_v37, %v1627_v22  ;;  %v209_v22 = vld [vmem:[%s2372_s1 + $0x28] sm:$0xff] }
  0xf1   : > { %606 = vmatpush.msra.mxu2 %v209_v22  ;;  %1462 = vmatpush.msra.mxu3 %v209_v22 }
  0xf2   : > { %v341_v40 = vmax.f32 %v318_v38, 0.0  ;;  %1066 = vperm.xlu0 %1474, %v1575_v10   ;;  %1050 = vperm.xlu1 %1475, %v1583_v12  }
  0xf4   : > { %v1105_v42 = vpack.c.bf16 %v341_v40, %v341_v40  ;;  %1432 = vmatmul.msk.f32.vlgmr.msrb.gmra.mxu3 %vm345_vm1, %v341_v40  ;;  %1046 = vperm.xlu2 %1476, %v1570_v9  }
  0xf6   : > { %1122 = vst.msk [vmem:[%s1634_s7 + $0x30] sm:$0xf] %vm1109_vm2, %v1105_v42 }
  0xfa   : > { %1062 = vperm.xlu1 %1475, %v1611_v18  }
  0xfc   : > { %1433 = vmatmul.msk.f32.gmra.mxu3 %vm345_vm1, %v342_v63  ;;  %1058 = vperm.xlu2 %1476, %v1603_v16  }
 0x102   : > { %1074 = vperm.xlu1 %1475, %v1596_v15  }
 0x104   : > { %1434 = vmatmul.msk.f32.gmra.mxu3 %vm345_vm1, %v343_v25  ;;  %1070 = vperm.xlu2 %1476, %v1586_v13  }
 0x10c   : > { %1435 = vmatmul.msk.f32.gmra.mxu3 %vm345_vm1, %v344_v33 }
 0x111   : > { %v411_v46 = vpop.f32.mrf.mxu1 }
 0x112   : > { %v460_v47 = vmul.f32 %v1712_v44, %v411_v46 }
 0x114   : > { %v477_v49 = vadd.f32 %v1715_v45, %v460_v47 }
 0x116   : > { %vm493_vm3 = vcmp.gt.f32.partialorder %v477_v49, 0.0  ;;  %v510_v50 = vmul.f32 %v1719_v48, %v477_v49 }
 0x118   : > { %v526_v51 = vsel %vm493_vm3, %v477_v49, %v510_v50 }
 0x119   : > { %v414_v52 = vpop.f32.mrf.mxu1  ;;  %1436 = vmatmul.msk.f32.vlgmr.msra.gmra.mxu2 %vm345_vm1, %v526_v51 }
 0x11a   : > { %v461_v53 = vmul.f32 %v1712_v44, %v414_v52 }
 0x11c   : > { %v478_v54 = vadd.f32 %v1715_v45, %v461_v53 }
 0x11e   : > { %vm494_vm4 = vcmp.gt.f32.partialorder %v478_v54, 0.0  ;;  %v511_v55 = vmul.f32 %v1719_v48, %v478_v54 }
 0x120   : > { %v527_v56 = vsel %vm494_vm4, %v478_v54, %v511_v55 }
 0x121   : > { %v417_v57 = vpop.f32.mrf.mxu1  ;;  %1437 = vmatmul.msk.f32.gmra.mxu2 %vm345_vm1, %v527_v56 }
 0x122   : > { %v462_v58 = vmul.f32 %v1712_v44, %v417_v57 }
 0x124   : > { %v479_v59 = vadd.f32 %v1715_v45, %v462_v58 }
 0x126   : > { %vm495_vm5 = vcmp.gt.f32.partialorder %v479_v59, 0.0  ;;  %v512_v61 = vmul.f32 %v1719_v48, %v479_v59 }
 0x128   : > { %v528_v62 = vsel %vm495_vm5, %v479_v59, %v512_v61  ;;  %vm656_vm5 = vcmask 162816  }
 0x129   : > { %v420_v63 = vpop.f32.mrf.mxu1  ;;  %1438 = vmatmul.msk.f32.gmra.mxu2 %vm345_vm1, %v528_v62 }
 0x12a   : > { %v463_v0 = vmul.f32 %v1712_v44, %v420_v63 }
 0x12c   : > { %v480_v11 = vadd.f32 %v1715_v45, %v463_v0 }
 0x12e   : > { %vm496_vm6 = vcmp.gt.f32.partialorder %v480_v11, 0.0  ;;  %v513_v17 = vmul.f32 %v1719_v48, %v480_v11 }
 0x130   : > { %v529_v1 = vsel %vm496_vm6, %v480_v11, %v513_v17 }
 0x131   : > { %v423_v2 = vpop.f32.mrf.mxu1  ;;  %1439 = vmatmul.msk.f32.gmra.mxu2 %vm345_vm1, %v529_v1 }
 0x132   : > { %v464_v3 = vmul.f32 %v1712_v44, %v423_v2  ;;  %v1801_v2 = vperm.slane %v1624_v21, 4 }
 0x134   : > { %v481_v19 = vadd.f32 %v1715_v45, %v464_v3 }
 0x136   : > { %vm497_vm7 = vcmp.gt.f32.partialorder %v481_v19, 0.0  ;;  %v514_v20 = vmul.f32 %v1719_v48, %v481_v19 }
 0x138   : > { %v530_v8 = vsel %vm497_vm7, %v481_v19, %v514_v20 }
 0x139   : > { %v426_v5 = vpop.f32.mrf.mxu1  ;;  %1440 = vmatmul.msk.f32.gmra.mxu2 %vm345_vm1, %v530_v8 }
 0x13a   : > { %v465_v4 = vmul.f32 %v1712_v44, %v426_v5 }
 0x13c   : > { %v482_v23 = vadd.f32 %v1715_v45, %v465_v4 }
 0x13e   : > { %vm498_vm8 = vcmp.gt.f32.partialorder %v482_v23, 0.0  ;;  %v515_v24 = vmul.f32 %v1719_v48, %v482_v23 }
 0x140   : > { %v531_v14 = vsel %vm498_vm8, %v482_v23, %v515_v24 }
 0x141   : > { %v429_v7 = vpop.f32.mrf.mxu1  ;;  %1441 = vmatmul.msk.f32.gmra.mxu2 %vm345_vm1, %v531_v14 }
 0x142   : > { %v466_v6 = vmul.f32 %v1712_v44, %v429_v7 }
 0x144   : > { %v483_v25 = vadd.f32 %v1715_v45, %v466_v6 }
 0x146   : > { %vm499_vm9 = vcmp.gt.f32.partialorder %v483_v25, 0.0  ;;  %v516_v26 = vmul.f32 %v1719_v48, %v483_v25 }
 0x148   : > { %v532_v27 = vsel %vm499_vm9, %v483_v25, %v516_v26 }
 0x149   : > { %v432_v10 = vpop.f32.mrf.mxu1  ;;  %1442 = vmatmul.msk.f32.gmra.mxu2 %vm345_vm1, %v532_v27 }
 0x14a   : > { %v467_v9 = vmul.f32 %v1712_v44, %v432_v10 }
 0x14c   : > { %v484_v12 = vadd.f32 %v1715_v45, %v467_v9 }
 0x14e   : > { %vm500_vm10 = vcmp.gt.f32.partialorder %v484_v12, 0.0  ;;  %v517_v28 = vmul.f32 %v1719_v48, %v484_v12 }
 0x150   : > { %v533_v29 = vsel %vm500_vm10, %v484_v12, %v517_v28 }
 0x151   : > { %v435_v30 = vpop.f32.mrf.mxu1  ;;  %1443 = vmatmul.msk.f32.gmra.mxu2 %vm345_vm1, %v533_v29 }
 0x152   : > { %v468_v16 = vmul.f32 %v1712_v44, %v435_v30 }
 0x154   : > { %v485_v18 = vadd.f32 %v1715_v45, %v468_v16 }
 0x156   : > { %vm501_vm11 = vcmp.gt.f32.partialorder %v485_v18, 0.0  ;;  %v518_v31 = vmul.f32 %v1719_v48, %v485_v18 }
 0x158   : > { %v534_v32 = vsel %vm501_vm11, %v485_v18, %v518_v31 }
 0x159   : > { %v438_v33 = vpop.f32.mrf.mxu1  ;;  %1444 = vmatmul.msk.f32.gmra.mxu2 %vm345_vm1, %v534_v32 }
 0x15a   : > { %v469_v34 = vmul.f32 %v1712_v44, %v438_v33 }
 0x15c   : > { %v486_v15 = vadd.f32 %v1715_v45, %v469_v34 }
 0x15e   : > { %vm502_vm12 = vcmp.gt.f32.partialorder %v486_v15, 0.0  ;;  %v519_v13 = vmul.f32 %v1719_v48, %v486_v15 }
 0x160   : > { %v535_v35 = vsel %vm502_vm12, %v486_v15, %v519_v13  ;;  %v1853_v15 = vpop.permute.xlu1 %1018 }
 0x161   : > { %v441_v36 = vpop.f32.mrf.mxu1  ;;  %1445 = vmatmul.msk.f32.gmra.mxu2 %vm345_vm1, %v535_v35  ;;  %v1855_v35 = vpop.permute.xlu0 %1014 }
 0x162   : > { %v470_v37 = vmul.f32 %v1712_v44, %v441_v36 }
 0x164   : > { %v487_v38 = vadd.f32 %v1715_v45, %v470_v37 }
 0x166   : > { %vm503_vm13 = vcmp.gt.f32.partialorder %v487_v38, 0.0  ;;  %v520_v39 = vmul.f32 %v1719_v48, %v487_v38 }
 0x168   : > { %v536_v40 = vsel %vm503_vm13, %v487_v38, %v520_v39  ;;  %v1862_v38 = vpop.permute.xlu1 %1030 }
 0x169   : > { %v444_v41 = vpop.f32.mrf.mxu1  ;;  %1446 = vmatmul.msk.f32.gmra.mxu2 %vm345_vm1, %v536_v40 }
 0x16a   : > { %v471_v42 = vmul.f32 %v1712_v44, %v444_v41  ;;  %v1867_v41 = vpop.permute.xlu0 %1042 }
 0x16c   : > { %v488_v43 = vadd.f32 %v1715_v45, %v471_v42 }
 0x16e   : > { %vm504_vm14 = vcmp.gt.f32.partialorder %v488_v43, 0.0  ;;  %v521_v22 = vmul.f32 %v1719_v48, %v488_v43 }
 0x170   : > { %v537_v46 = vsel %vm504_vm14, %v488_v43, %v521_v22  ;;  %v1871_v43 = vpop.permute.xlu2 %1022  ;;  %v1873_v22 = vpop.permute.xlu1 %1038 }
 0x171   : > { %1447 = vmatmul.msk.f32.gmra.mxu2 %vm345_vm1, %v537_v46 }
 0x172   : > { %v1875_v46 = vpop.permute.xlu0 %1054 }
 0x177   : > { %v447_v47 = vpop.f32.mrf.mxu3 }
 0x178   : > { %v472_v49 = vmul.f32 %v1712_v44, %v447_v47 }
 0x17a   : > { %v489_v50 = vadd.f32 %v1715_v45, %v472_v49  ;;  %v1877_v49 = vpop.permute.xlu2 %1026 }
 0x17c   : > { %vm505_vm15 = vcmp.gt.f32.partialorder %v489_v50, 0.0  ;;  %v522_v51 = vmul.f32 %v1719_v48, %v489_v50 }
 0x17e   : > { %v538_v52 = vsel %vm505_vm15, %v489_v50, %v522_v51 }
 0x17f   : > { %v450_v53 = vpop.f32.mrf.mxu3  ;;  %1448 = vmatmul.msk.f32.vlgmr.msra.gmra.mxu3 %vm345_vm1, %v538_v52  ;;  %v1884_v52 = vpop.permute.xlu1 %1050 }
 0x180   : > { %v473_v54 = vmul.f32 %v1712_v44, %v450_v53 }
 0x182   : > { %v490_v55 = vadd.f32 %v1715_v45, %v473_v54  ;;  %v1886_v54 = vpop.permute.xlu0 %1066 }
 0x183   : > { %2380 = vst [vmem:[#allocation3_spill] sm:$0xff] %v1886_v54 }
 0x184   : > { %vm506_vm2 = vcmp.gt.f32.partialorder %v490_v55, 0.0  ;;  %v523_v56 = vmul.f32 %v1719_v48, %v490_v55 }
 0x186   : > { %v539_v57 = vsel %vm506_vm2, %v490_v55, %v523_v56  ;;  %v1891_v56 = vpop.permute.xlu2 %1034 }
 0x187   : > { %v453_v58 = vpop.f32.mrf.mxu3  ;;  %1449 = vmatmul.msk.f32.gmra.mxu3 %vm345_vm1, %v539_v57 }
 0x188   : > { %v474_v59 = vmul.f32 %v1712_v44, %v453_v58  ;;  %v705_v58 = vlaneseq }
 0x18a   : > { %v491_v60 = vadd.f32 %v1715_v45, %v474_v59  ;;  %v1895_v59 = vpop.permute.xlu1 %1062 }
 0x18b   : > { %2382 = vst [vmem:[#allocation5_spill] sm:$0xff] %v1895_v59 }
 0x18c   : > { %vm507_vm3 = vcmp.gt.f32.partialorder %v491_v60, 0.0  ;;  %v524_v61 = vmul.f32 %v1719_v48, %v491_v60 }
 0x18e   : > { %v540_v62 = vsel %vm507_vm3, %v491_v60, %v524_v61  ;;  %v1897_v60 = vand.u32 127, %v705_v58 }
 0x18f   : > { %v456_v63 = vpop.f32.mrf.mxu3  ;;  %1450 = vmatmul.msk.f32.gmra.mxu3 %vm345_vm1, %v540_v62 }
 0x190   : > { %v475_v0 = vmul.f32 %v1712_v44, %v456_v63 }
 0x192   : > { %v492_v11 = vadd.f32 %v1715_v45, %v475_v0 }
 0x194   : > { %vm508_vm4 = vcmp.gt.f32.partialorder %v492_v11, 0.0  ;;  %v525_v17 = vmul.f32 %v1719_v48, %v492_v11 }
 0x196   : > { %v541_v1 = vsel %vm508_vm4, %v492_v11, %v525_v17 }
 0x197   : > { %1451 = vmatmul.msk.f32.gmra.mxu3 %vm345_vm1, %v541_v1  ;;  %v1909_v1 = vpop.permute.xlu2 %1046 }
 0x19c   : > { %v608_v3 = vpop.f32.mrf.mxu2 }
 0x19d   : > { %v1804_v19 = vadd.f32 %v608_v3, %v1801_v2 }
 0x19f   : > { %v657_v20 = vsel %vm656_vm5, %v1804_v19, -inf }
 0x1a0   : > { %658 = vmax.xlane.f32.xlu0 %v657_v20 }
 0x1a4   : > { %v611_v44 = vpop.f32.mrf.mxu2 }
 0x1a5   : > { %v1809_v45 = vadd.f32 %v611_v44, %v1801_v2 }
 0x1a7   : > { %v660_v48 = vsel %vm656_vm5, %v1809_v45, -inf }
 0x1a8   : > { %661 = vmax.xlane.f32.xlu0 %v660_v48  ;;  %v1914_v48 = vpop.permute.xlu1 %1074 }
 0x1a9   : > { %2384 = vst [vmem:[#allocation7_spill] sm:$0xff] %v1914_v48 }
 0x1ac   : > { %v614_v8 = vpop.f32.mrf.mxu2 }
 0x1ad   : > { %v1814_v21 = vadd.f32 %v614_v8, %v1801_v2 }
 0x1af   : > { %v663_v5 = vsel %vm656_vm5, %v1814_v21, -inf }
 0x1b0   : > { %664 = vmax.xlane.f32.xlu1 %v663_v5 }
 0x1b4   : > { %v617_v4 = vpop.f32.mrf.mxu2 }
 0x1b5   : > { %v1819_v23 = vadd.f32 %v617_v4, %v1801_v2 }
 0x1b7   : > { %v666_v24 = vsel %vm656_vm5, %v1819_v23, -inf }
 0x1b8   : > { %667 = vmax.xlane.f32.xlu1 %v666_v24 }
 0x1bc   : > { %v620_v14 = vpop.f32.mrf.mxu2 }
 0x1bd   : > { %v1824_v7 = vadd.f32 %v620_v14, %v1801_v2 }
 0x1bf   : > { %v669_v6 = vsel %vm656_vm5, %v1824_v7, -inf }
 0x1c0   : > { %670 = vmax.xlane.f32.xlu2 %v669_v6 }
 0x1c4   : > { %v623_v25 = vpop.f32.mrf.mxu2 }
 0x1c5   : > { %v1829_v26 = vadd.f32 %v623_v25, %v1801_v2  ;;  %v1928_v25 = vpop.permute.xlu2 %1058 }
 0x1c7   : > { %v672_v27 = vsel %vm656_vm5, %v1829_v26, -inf }
 0x1c8   : > { %673 = vmax.xlane.f32.xlu2 %v672_v27 }
 0x1cc   : > { %v626_v10 = vpop.f32.mrf.mxu2 }
 0x1cd   : > { %v1834_v9 = vadd.f32 %v626_v10, %v1801_v2 }
 0x1cf   : > { %v675_v12 = vsel %vm656_vm5, %v1834_v9, -inf }
 0x1d0   : > { %676 = vmax.xlane.f32.xlu0 %v675_v12 }
 0x1d4   : > { %v629_v28 = vpop.f32.mrf.mxu2 }
 0x1d5   : > { %v1839_v29 = vadd.f32 %v629_v28, %v1801_v2 }
 0x1d7   : > { %v678_v30 = vsel %vm656_vm5, %v1839_v29, -inf }
 0x1d8   : > { %679 = vmax.xlane.f32.xlu1 %v678_v30 }
 0x1dc   : > { %v632_v16 = vpop.f32.mrf.mxu2 }
 0x1dd   : > { %v1844_v18 = vadd.f32 %v632_v16, %v1801_v2  ;;  %v1941_v16 = vpop.permute.xlu2 %1070 }
 0x1de   : > { %2386 = vst [vmem:[#allocation9_spill] sm:$0xff] %v1941_v16 }
 0x1df   : > { %v681_v31 = vsel %vm656_vm5, %v1844_v18, -inf }
 0x1e0   : > { %682 = vmax.xlane.f32.xlu2 %v681_v31 }
 0x1e4   : > { %v635_v32 = vpop.f32.mrf.mxu2 }
 0x1e5   : > { %v1849_v33 = vadd.f32 %v635_v32, %v1801_v2 }
 0x1e7   : > { %v684_v34 = vsel %vm656_vm5, %v1849_v33, -inf }
 0x1e8   : > { %685 = vmax.xlane.f32.xlu0 %v684_v34 }
 0x1ec   : > { %v638_v13 = vpop.f32.mrf.mxu2 }
 0x1ed   : > { %v1858_v36 = vadd.f32 %v638_v13, %v1801_v2 }
 0x1ef   : > { %v687_v37 = vsel %vm656_vm5, %v1858_v36, -inf }
 0x1f0   : > { %688 = vmax.xlane.f32.xlu1 %v687_v37 }
 0x1f4   : > { %v641_v39 = vpop.f32.mrf.mxu2 }
 0x1f5   : > { %v1865_v40 = vadd.f32 %v641_v39, %v1801_v2 }
 0x1f7   : > { %v690_v42 = vsel %vm656_vm5, %v1865_v40, -inf }
 0x1f8   : > { %691 = vmax.xlane.f32.xlu2 %v690_v42 }
 0x202   : > { %v644_v47 = vpop.f32.mrf.mxu3 }
 0x203   : > { %v1880_v50 = vadd.f32 %v644_v47, %v1801_v2 }
 0x205   : > { %2379 = vst [vmem:[#allocation2_spill] sm:$0xff] %v1880_v50  ;;  %v693_v51 = vsel %vm656_vm5, %v1880_v50, -inf }
 0x206   : > { %694 = vmax.xlane.f32.xlu0 %v693_v51 }
 0x20a   : > { %v647_v53 = vpop.f32.mrf.mxu3 }
 0x20b   : > { %v1889_v55 = vadd.f32 %v647_v53, %v1801_v2 }
 0x20d   : > { %2381 = vst [vmem:[#allocation4_spill] sm:$0xff] %v1889_v55  ;;  %v696_v57 = vsel %vm656_vm5, %v1889_v55, -inf }
 0x20e   : > { %697 = vmax.xlane.f32.xlu1 %v696_v57 }
 0x212   : > { %v650_v61 = vpop.f32.mrf.mxu3 }
 0x213   : > { %v1900_v62 = vadd.f32 %v650_v61, %v1801_v2  ;;  %v659_v63 = vpop.xlane.xlu0 %658 }
 0x214   : > { %vm707_vm1 = vcmp.eq.f32.partialorder %v1804_v19, %v659_v63 }
 0x215   : > { %2383 = vst [vmem:[#allocation6_spill] sm:$0xff] %v1900_v62  ;;  %v723_v0 = vsel %vm707_vm1, %v1897_v60, 20  ;;  %v699_v11 = vsel %vm656_vm5, %v1900_v62, -inf }
 0x216   : > { %v1907_v17 = vsel %vm656_vm5, %v723_v0, 2147483647  ;;  %700 = vmax.xlane.f32.xlu2 %v699_v11 }
 0x217   : > { %v741_v3 = vshra.s32 %v1907_v17, 16 }
 0x219   : > { %v1912_v20 = vcvt.s32.f32 %v741_v3 }
 0x21a   : > { %v653_v44 = vpop.f32.mrf.mxu3 }
 0x21b   : > { %v1917_v8 = vadd.f32 %v653_v44, %v1801_v2  ;;  %v662_v5 = vpop.xlane.xlu0 %661  ;;  %744 = vmin.xlane.f32.xlu1 %v1912_v20 }
 0x21c   : > { %vm708_vm6 = vcmp.eq.f32.partialorder %v1809_v45, %v662_v5 }
 0x21d   : > { %2385 = vst [vmem:[#allocation8_spill] sm:$0xff] %v1917_v8  ;;  %v724_v4 = vsel %vm708_vm6, %v1897_v60, 20  ;;  %v702_v24 = vsel %vm656_vm5, %v1917_v8, -inf }
 0x21e   : > { %v1925_v14 = vsel %vm656_vm5, %v724_v4, 2147483647  ;;  %703 = vmax.xlane.f32.xlu0 %v702_v24 }
 0x21f   : > { %v756_v6 = vshra.s32 %v1925_v14, 16 }
 0x221   : > { %v1931_v27 = vcvt.s32.f32 %v756_v6 }
 0x223   : > { %v665_v2 = vpop.xlane.xlu1 %664 }
 0x224   : > { %vm709_vm7 = vcmp.eq.f32.partialorder %v1814_v21, %v665_v2 }
 0x225   : > { %v725_v10 = vsel %vm709_vm7, %v1897_v60, 20 }
 0x226   : > { %v1935_v12 = vsel %vm656_vm5, %v725_v10, 2147483647  ;;  %759 = vmin.xlane.f32.xlu0 %v1931_v27 }
 0x227   : > { %v771_v28 = vshra.s32 %v1935_v12, 16 }
 0x229   : > { %v1939_v30 = vcvt.s32.f32 %v771_v28 }
 0x22b   : > { %v668_v31 = vpop.xlane.xlu1 %667  ;;  %774 = vmin.xlane.f32.xlu2 %v1939_v30 }
 0x22c   : > { %vm710_vm8 = vcmp.eq.f32.partialorder %v1819_v23, %v668_v31 }
 0x22d   : > { %v726_v32 = vsel %vm710_vm8, %v1897_v60, 20 }
 0x22e   : > { %v1947_v34 = vsel %vm656_vm5, %v726_v32, 2147483647 }
 0x22f   : > { %v786_v13 = vshra.s32 %v1947_v34, 16 }
 0x231   : > { %v1950_v37 = vcvt.s32.f32 %v786_v13 }
 0x233   : > { %v671_v39 = vpop.xlane.xlu2 %670  ;;  %789 = vmin.xlane.f32.xlu1 %v1950_v37 }
 0x234   : > { %vm711_vm9 = vcmp.eq.f32.partialorder %v1824_v7, %v671_v39 }
 0x235   : > { %v727_v42 = vsel %vm711_vm9, %v1897_v60, 20 }
 0x236   : > { %v1956_v47 = vsel %vm656_vm5, %v727_v42, 2147483647 }
 0x237   : > { %v801_v51 = vshra.s32 %v1956_v47, 16 }
 0x239   : > { %v1959_v53 = vcvt.s32.f32 %v801_v51 }
 0x23b   : > { %v674_v57 = vpop.xlane.xlu2 %673  ;;  %804 = vmin.xlane.f32.xlu0 %v1959_v53 }
 0x23c   : > { %vm712_vm10 = vcmp.eq.f32.partialorder %v1829_v26, %v674_v57 }
 0x23d   : > { %v728_v58 = vsel %vm712_vm10, %v1897_v60, 20 }
 0x23e   : > { %v1965_v61 = vsel %vm656_vm5, %v728_v58, 2147483647 }
 0x23f   : > { %v816_v63 = vshra.s32 %v1965_v61, 16 }
 0x241   : > { %v1968_v0 = vcvt.s32.f32 %v816_v63 }
 0x243   : > { %v677_v11 = vpop.xlane.xlu0 %676  ;;  %819 = vmin.xlane.f32.xlu2 %v1968_v0 }
 0x244   : > { %vm713_vm11 = vcmp.eq.f32.partialorder %v1834_v9, %v677_v11 }
 0x245   : > { %v729_v3 = vsel %vm713_vm11, %v1897_v60, 20 }
 0x246   : > { %v1974_v44 = vsel %vm656_vm5, %v729_v3, 2147483647 }
 0x247   : > { %v831_v5 = vshra.s32 %v1974_v44, 16 }
 0x249   : > { %v1977_v4 = vcvt.s32.f32 %v831_v5 }
 0x24b   : > { %v680_v24 = vpop.xlane.xlu1 %679  ;;  %834 = vmin.xlane.f32.xlu1 %v1977_v4 }
 0x24c   : > { %vm714_vm12 = vcmp.eq.f32.partialorder %v1839_v29, %v680_v24 }
 0x24d   : > { %v730_v6 = vsel %vm714_vm12, %v1897_v60, 20 }
 0x24e   : > { %v1983_v2 = vsel %vm656_vm5, %v730_v6, 2147483647 }
 0x24f   : > { %v846_v10 = vshra.s32 %v1983_v2, 16 }
 0x251   : > { %v1986_v28 = vcvt.s32.f32 %v846_v10 }
 0x253   : > { %v683_v31 = vpop.xlane.xlu2 %682  ;;  %849 = vmin.xlane.f32.xlu0 %v1986_v28 }
 0x254   : > { %vm715_vm13 = vcmp.eq.f32.partialorder %v1844_v18, %v683_v31 }
 0x255   : > { %v731_v32 = vsel %vm715_vm13, %v1897_v60, 20 }
 0x256   : > { %v1992_v13 = vsel %vm656_vm5, %v731_v32, 2147483647 }
 0x257   : > { %v861_v39 = vshra.s32 %v1992_v13, 16 }
 0x259   : > { %v1995_v42 = vcvt.s32.f32 %v861_v39 }
 0x25b   : > { %v686_v51 = vpop.xlane.xlu0 %685  ;;  %864 = vmin.xlane.f32.xlu2 %v1995_v42 }
 0x25c   : > { %vm716_vm14 = vcmp.eq.f32.partialorder %v1849_v33, %v686_v51 }
 0x25d   : > { %v732_v57 = vsel %vm716_vm14, %v1897_v60, 20 }
 0x25e   : > { %v2001_v58 = vsel %vm656_vm5, %v732_v57, 2147483647 }
 0x25f   : > { %v876_v63 = vshra.s32 %v2001_v58, 16 }
 0x261   : > { %v2004_v11 = vcvt.s32.f32 %v876_v63 }
 0x263   : > { %879 = vmin.xlane.f32.xlu1 %v2004_v11  ;;  %v689_v3 = vpop.xlane.xlu1 %688 }
 0x264   : > { %vm717_vm15 = vcmp.eq.f32.partialorder %v1858_v36, %v689_v3 }
 0x265   : > { %v733_v5 = vsel %vm717_vm15, %v1897_v60, 20 }
 0x266   : > { %v2010_v24 = vsel %vm656_vm5, %v733_v5, 2147483647 }
 0x267   : > { %v891_v6 = vshra.s32 %v2010_v24, 16 }
 0x269   : > { %v2013_v10 = vcvt.s32.f32 %v891_v6 }
 0x26b   : > { %894 = vmin.xlane.f32.xlu0 %v2013_v10  ;;  %v692_v31 = vpop.xlane.xlu2 %691 }
 0x26c   : > { %vm718_vm2 = vcmp.eq.f32.partialorder %v1865_v40, %v692_v31 }
 0x26d   : > { %v734_v32 = vsel %vm718_vm2, %v1897_v60, 20 }
 0x26e   : > { %v2019_v39 = vsel %vm656_vm5, %v734_v32, 2147483647 }
 0x26f   : > { %v906_v51 = vshra.s32 %v2019_v39, 16 }
 0x271   : > { %v2022_v57 = vcvt.s32.f32 %v906_v51 }
 0x273   : > { %909 = vmin.xlane.f32.xlu2 %v2022_v57 }
 0x279   : > { %v695_v63 = vpop.xlane.xlu0 %694 }
 0x27a   : > { %vm719_vm3 = vcmp.eq.f32.partialorder %v1880_v50, %v695_v63 }
 0x27b   : > { %v735_v3 = vsel %vm719_vm3, %v1897_v60, 20 }
 0x27c   : > { %v2028_v5 = vsel %vm656_vm5, %v735_v3, 2147483647 }
 0x27d   : > { %v921_v6 = vshra.s32 %v2028_v5, 16 }
 0x27f   : > { %v2031_v31 = vcvt.s32.f32 %v921_v6  ;;  %v740_v6 = vand.u32 65535, %v1907_v17  ;;  %v755_v17 = vand.u32 65535, %v1925_v14 }
 0x281   : > { %924 = vmin.xlane.f32.xlu1 %v2031_v31  ;;  %v698_v32 = vpop.xlane.xlu1 %697 }
 0x282   : > { %vm720_vm4 = vcmp.eq.f32.partialorder %v1889_v55, %v698_v32  ;;  %v742_v32 = vcvt.s32.f32 %v740_v6 }
 0x283   : > { %v736_v51 = vsel %vm720_vm4, %v1897_v60, 20 }
 0x284   : > { %v2037_v48 = vsel %vm656_vm5, %v736_v51, 2147483647 }
 0x285   : > { %v936_v63 = vshra.s32 %v2037_v48, 16 }
 0x287   : > { %v2040_v54 = vcvt.s32.f32 %v936_v63 }
 0x289   : > { %939 = vmin.xlane.f32.xlu0 %v2040_v54  ;;  %v701_v3 = vpop.xlane.xlu2 %700 }
 0x28a   : > { %vm721_vm1 = vcmp.eq.f32.partialorder %v1900_v62, %v701_v3 }
 0x28b   : > { %v737_v16 = vsel %vm721_vm1, %v1897_v60, 20 }
 0x28c   : > { %v2051_v51 = vsel %vm656_vm5, %v737_v16, 2147483647  ;;  %v770_v16 = vand.u32 65535, %v1935_v12 }
 0x28d   : > { %v951_v50 = vshra.s32 %v2051_v51, 16 }
 0x28e   : > { %v2046_v59 = vpop.xlane.xlu1 %744 }
 0x28f   : > { %vm746_vm6 = vcmp.eq.f32.partialorder %v1912_v20, %v2046_v59  ;;  %v2056_v3 = vcvt.s32.f32 %v951_v50  ;;  %v757_v20 = vcvt.s32.f32 %v755_v17  ;;  %v772_v50 = vcvt.s32.f32 %v770_v16 }
 0x290   : > { %v747_v63 = vsel %vm746_vm6, %v742_v32, inf  ;;  %v800_v16 = vand.u32 65535, %v1956_v47  ;;  %v830_v47 = vand.u32 65535, %v1974_v44  ;;  %v860_v44 = vand.u32 65535, %v1992_v13 }
 0x291   : > { %v704_v55 = vpop.xlane.xlu0 %703  ;;  %748 = vmin.xlane.f32.xlu2 %v747_v63  ;;  %v890_v13 = vand.u32 65535, %v2010_v24  ;;  %v920_v24 = vand.u32 65535, %v2028_v5  ;;  %v751_v5 = vcvt.f32.s32 %v2046_v59  ;;  %vm979_vm6 = vcmp.eq.s32.totalorder %v1897_v60, 23 }
 0x292   : > { %vm722_vm7 = vcmp.eq.f32.partialorder %v1917_v8, %v704_v55 }
 0x293   : > { %v738_v62 = vsel %vm722_vm7, %v1897_v60, 20  ;;  %vm1012_vm7 = vcmp.eq.s32.totalorder %v1897_v60, 24 }
 0x294   : > { %v2066_v32 = vsel %vm656_vm5, %v738_v62, 2147483647 }
 0x295   : > { %v966_v63 = vshra.s32 %v2066_v32, 16 }
 0x297   : > { %v2073_v17 = vcvt.s32.f32 %v966_v63 }
 0x299   : > { %v2059_v6 = vpop.xlane.xlu0 %759  ;;  %954 = vmin.xlane.f32.xlu2 %v2056_v3 }
 0x29a   : > { %vm761_vm8 = vcmp.eq.f32.partialorder %v1931_v27, %v2059_v6  ;;  %v785_v27 = vand.u32 65535, %v1947_v34  ;;  %v815_v34 = vand.u32 65535, %v1965_v61  ;;  %v845_v61 = vand.u32 65535, %v1983_v2 }
 0x29b   : > { %v762_v55 = vsel %vm761_vm8, %v757_v20, inf  ;;  %v875_v2 = vand.u32 65535, %v2001_v58  ;;  %v905_v58 = vand.u32 65535, %v2019_v39  ;;  %v935_v39 = vand.u32 65535, %v2037_v48 }
 0x29c   : > { %763 = vmin.xlane.f32.xlu1 %v762_v55  ;;  %v787_v12 = vcvt.s32.f32 %v785_v27  ;;  %v817_v63 = vcvt.s32.f32 %v815_v34 }
 0x29e   : > { %v2068_v14 = vpop.xlane.xlu2 %774 }
 0x29f   : > { %vm776_vm9 = vcmp.eq.f32.partialorder %v1939_v30, %v2068_v14  ;;  %v802_v30 = vcvt.s32.f32 %v800_v16  ;;  %v847_v16 = vcvt.s32.f32 %v845_v61 }
 0x2a0   : > { %v777_v8 = vsel %vm776_vm9, %v772_v50, inf }
 0x2a1   : > { %778 = vmin.xlane.f32.xlu0 %v777_v8 }
 0x2a4   : > { %969 = vmin.xlane.f32.xlu1 %v2073_v17 }
 0x2a6   : > { %v2077_v62 = vpop.xlane.xlu1 %789 }
 0x2a7   : > { %vm791_vm5 = vcmp.eq.f32.partialorder %v1950_v37, %v2077_v62 }
 0x2a8   : > { %v792_v20 = vsel %vm791_vm5, %v787_v12, inf  ;;  %v832_v12 = vcvt.s32.f32 %v830_v47  ;;  %v892_v47 = vcvt.s32.f32 %v890_v13  ;;  %vm1206_vm5 = vcmask 519424  }
 0x2a9   : > { %793 = vmin.xlane.f32.xlu2 %v792_v20 }
 0x2ae   : > { %v2082_v55 = vpop.xlane.xlu0 %804 }
 0x2af   : > { %vm806_vm10 = vcmp.eq.f32.partialorder %v1959_v53, %v2082_v55 }
 0x2b0   : > { %v807_v8 = vsel %vm806_vm10, %v802_v30, inf }
 0x2b1   : > { %808 = vmin.xlane.f32.xlu1 %v807_v8  ;;  %v862_v8 = vcvt.s32.f32 %v860_v44  ;;  %v937_v44 = vcvt.s32.f32 %v935_v39 }
 0x2b6   : > { %v2087_v50 = vpop.xlane.xlu2 %819 }
 0x2b7   : > { %vm821_vm11 = vcmp.eq.f32.partialorder %v1968_v0, %v2087_v50 }
 0x2b8   : > { %v822_v37 = vsel %vm821_vm11, %v817_v63, inf  ;;  %v877_v63 = vcvt.s32.f32 %v875_v2 }
 0x2b9   : > { %823 = vmin.xlane.f32.xlu0 %v822_v37 }
 0x2be   : > { %v2092_v27 = vpop.xlane.xlu1 %834 }
 0x2bf   : > { %vm836_vm12 = vcmp.eq.f32.partialorder %v1977_v4, %v2092_v27 }
 0x2c0   : > { %v837_v53 = vsel %vm836_vm12, %v832_v12, inf }
 0x2c1   : > { %838 = vmin.xlane.f32.xlu2 %v837_v53  ;;  %v907_v53 = vcvt.s32.f32 %v905_v58 }
 0x2c6   : > { %v2097_v20 = vpop.xlane.xlu0 %849 }
 0x2c7   : > { %vm851_vm13 = vcmp.eq.f32.partialorder %v1986_v28, %v2097_v20 }
 0x2c8   : > { %v852_v0 = vsel %vm851_vm13, %v847_v16, inf  ;;  %v922_v16 = vcvt.s32.f32 %v920_v24 }
 0x2c9   : > { %853 = vmin.xlane.f32.xlu1 %v852_v0 }
 0x2ce   : > { %v2102_v30 = vpop.xlane.xlu2 %864 }
 0x2cf   : > { %vm866_vm14 = vcmp.eq.f32.partialorder %v1995_v42, %v2102_v30 }
 0x2d0   : > { %v867_v4 = vsel %vm866_vm14, %v862_v8, inf }
 0x2d1   : > { %868 = vmin.xlane.f32.xlu0 %v867_v4  ;;  %v752_v4 = vshll.u32 %v751_v5, 16 }
 0x2d6   : > { %v2107_v34 = vpop.xlane.xlu1 %879 }
 0x2d7   : > { %vm881_vm15 = vcmp.eq.f32.partialorder %v2004_v11, %v2107_v34 }
 0x2d8   : > { %v882_v28 = vsel %vm881_vm15, %v877_v63, inf }
 0x2d9   : > { %883 = vmin.xlane.f32.xlu2 %v882_v28 }
 0x2de   : > { %v2112_v37 = vpop.xlane.xlu0 %894 }
 0x2df   : > { %vm896_vm2 = vcmp.eq.f32.partialorder %v2013_v10, %v2112_v37 }
 0x2e0   : > { %v897_v42 = vsel %vm896_vm2, %v892_v47, inf }
 0x2e1   : > { %898 = vmin.xlane.f32.xlu1 %v897_v42 }
 0x2e6   : > { %v2117_v12 = vpop.xlane.xlu2 %909 }
 0x2e7   : > { %vm911_vm3 = vcmp.eq.f32.partialorder %v2022_v57, %v2117_v12 }
 0x2e8   : > { %v912_v11 = vsel %vm911_vm3, %v907_v53, inf }
 0x2e9   : > { %913 = vmin.xlane.f32.xlu0 %v912_v11 }
 0x2f4   : > { %v2122_v61 = vpop.xlane.xlu1 %924 }
 0x2f5   : > { %vm926_vm4 = vcmp.eq.f32.partialorder %v2031_v31, %v2122_v61  ;;  %v950_v31 = vand.u32 65535, %v2051_v51 }
 0x2f6   : > { %v927_v10 = vsel %vm926_vm4, %v922_v16, inf }
 0x2f7   : > { %928 = vmin.xlane.f32.xlu2 %v927_v10  ;;  %v952_v59 = vcvt.s32.f32 %v950_v31 }
 0x2fc   : > { %v2127_v0 = vpop.xlane.xlu0 %939 }
 0x2fd   : > { %vm941_vm1 = vcmp.eq.f32.partialorder %v2040_v54, %v2127_v0  ;;  %v766_v54 = vcvt.f32.s32 %v2059_v6  ;;  %v781_v6 = vcvt.f32.s32 %v2068_v14 }
 0x2fe   : > { %v942_v57 = vsel %vm941_vm1, %v937_v44, inf }
 0x2ff   : > { %943 = vmin.xlane.f32.xlu1 %v942_v57  ;;  %v782_v16 = vshll.u32 %v781_v6, 16 }
 0x304   : > { %v749_v8 = vpop.xlane.xlu2 %748 }
 0x305   : > { %v750_v2 = vcvt.f32.s32 %v749_v8  ;;  %v796_v8 = vcvt.f32.s32 %v2077_v62 }
 0x307   : > { %v753_v63 = vadd.s32 %v752_v4, %v750_v2  ;;  %v797_v2 = vshll.u32 %v796_v8, 16 }
 0x309   : > { %v980_v28 = vcvt.s32.f32 %v753_v63  ;;  %v811_v63 = vcvt.f32.s32 %v2082_v55 }
 0x30b   : > { %v996_v48 = vsel %vm979_vm6, %v980_v28, %v1804_v19  ;;  %v767_v19 = vshll.u32 %v766_v54, 16 }
 0x30c   : > { %v2139_v13 = vpop.xlane.xlu2 %954  ;;  %v1077_v47 = vsel %vm1012_vm7, %v1855_v35, %v996_v48  ;;  %v812_v48 = vshll.u32 %v811_v63, 16 }
 0x30d   : > { %vm956_vm8 = vcmp.eq.f32.partialorder %v2056_v3, %v2139_v13  ;;  %v1126_v31 = vpack.c.bf16 %v1077_v47, %v1077_v47 }
 0x30e   : > { %v957_v51 = vsel %vm956_vm8, %v952_v59, inf }
 0x30f   : > { %v764_v42 = vpop.xlane.xlu1 %763  ;;  %1239 = vrot.lane.b32.xlu2 %v1077_v47, %s1486_s19  ;;  %958 = vmin.xlane.f32.xlu0 %v957_v51 }
 0x310   : > { %v765_v58 = vcvt.f32.s32 %v764_v42 }
 0x312   : > { %v768_v53 = vadd.s32 %v767_v19, %v765_v58 }
 0x314   : > { %v981_v11 = vcvt.s32.f32 %v768_v53  ;;  %v779_v24 = vpop.xlane.xlu0 %778  ;;  %v841_v53 = vcvt.f32.s32 %v2092_v27 }
 0x315   : > { %v780_v10 = vcvt.f32.s32 %v779_v24  ;;  %v965_v24 = vand.u32 65535, %v2066_v32 }
 0x316   : > { %v997_v3 = vsel %vm979_vm6, %v981_v11, %v1809_v45 }
 0x317   : > { %v783_v35 = vadd.s32 %v782_v16, %v780_v10  ;;  %v2154_v39 = vsel %vm1012_vm7, %v1853_v15, %v997_v3  ;;  %v2161_v57 = vpop.xlane.xlu1 %969 }
 0x318   : > { %1241 = vrot.lane.b32.xlu1 %v2154_v39, %s1486_s19  ;;  %vm971_vm9 = vcmp.eq.f32.partialorder %v2073_v17, %v2161_v57 }
 0x319   : > { %v982_v44 = vcvt.s32.f32 %v783_v35  ;;  %v967_v35 = vcvt.s32.f32 %v965_v24 }
 0x31b   : > { %v998_v14 = vsel %vm979_vm6, %v982_v44, %v1814_v21  ;;  %v972_v32 = vsel %vm971_vm9, %v967_v35, inf }
 0x31c   : > { %v794_v5 = vpop.xlane.xlu2 %793  ;;  %v1079_v45 = vsel %vm1012_vm7, %v1871_v43, %v998_v14  ;;  %v826_v43 = vcvt.f32.s32 %v2087_v50  ;;  %v856_v14 = vcvt.f32.s32 %v2097_v20 }
 0x31d   : > { %v1128_v4 = vpack.c.bf16 %v1079_v45, %v1079_v45  ;;  %v795_v15 = vcvt.f32.s32 %v794_v5 }
 0x31e   : > { %v827_v58 = vshll.u32 %v826_v43, 16  ;;  %v857_v17 = vshll.u32 %v856_v14, 16 }
 0x31f   : > { %v798_v28 = vadd.s32 %v797_v2, %v795_v15  ;;  %v871_v15 = vcvt.f32.s32 %v2102_v30  ;;  %v886_v30 = vcvt.f32.s32 %v2107_v34 }
 0x320   : > { %1162 = vrot.lane.b32.xlu1 %v1128_v4, %s1487_s20 }
 0x321   : > { %v983_v59 = vcvt.s32.f32 %v798_v28  ;;  %v872_v28 = vshll.u32 %v871_v15, 16 }
 0x323   : > { %1158 = vrot.lane.b32.xlu0 %v1126_v31, %s1487_s20  ;;  %v999_v55 = vsel %vm979_vm6, %v983_v59, %v1819_v23 }
 0x324   : > { %v809_v21 = vpop.xlane.xlu1 %808  ;;  %v1080_v50 = vsel %vm1012_vm7, %v1877_v49, %v999_v55  ;;  %v842_v49 = vshll.u32 %v841_v53, 16 }
 0x325   : > { %v810_v54 = vcvt.f32.s32 %v809_v21  ;;  %v1129_v23 = vpack.c.bf16 %v1080_v50, %v1080_v50 }
 0x327   : > { %v813_v51 = vadd.s32 %v812_v48, %v810_v54 }
 0x329   : > { %v984_v62 = vcvt.s32.f32 %v813_v51  ;;  %v887_v51 = vshll.u32 %v886_v30, 16 }
 0x32b   : > { %1243 = vrot.lane.b32.xlu0 %v1079_v45, %s1486_s19  ;;  %v1000_v42 = vsel %vm979_vm6, %v984_v62, %v1824_v7  ;;  %v1127_v62 = vpack.c.bf16 %v2154_v39, %v2154_v39 }
 0x32c   : > { %v824_v47 = vpop.xlane.xlu0 %823  ;;  %v2181_v19 = vsel %vm1012_vm7, %v1862_v38, %v1000_v42 }
 0x32d   : > { %v825_v6 = vcvt.f32.s32 %v824_v47  ;;  %1247 = vrot.lane.b32.xlu1 %v2181_v19, %s1486_s19 }
 0x32f   : > { %v828_v7 = vadd.s32 %v827_v58, %v825_v6 }
 0x331   : > { %v985_v11 = vcvt.s32.f32 %v828_v7 }
 0x333   : > { %1164 = vrot.lane.b32.xlu0 %v1129_v23, %s1487_s20  ;;  %v1001_v38 = vsel %vm979_vm6, %v985_v11, %v1829_v26 }
 0x334   : > { %v839_v16 = vpop.xlane.xlu2 %838  ;;  %v1082_v10 = vsel %vm1012_vm7, %v1891_v56, %v1001_v38  ;;  %v1130_v38 = vpack.c.bf16 %v2181_v19, %v2181_v19 }
 0x335   : > { %v840_v27 = vcvt.f32.s32 %v839_v16  ;;  %v1131_v3 = vpack.c.bf16 %v1082_v10, %v1082_v10 }
 0x337   : > { %v843_v44 = vadd.s32 %v842_v49, %v840_v27  ;;  %1168 = vrot.lane.b32.xlu1 %v1131_v3, %s1487_s20 }
 0x338   : > { %973 = vmin.xlane.f32.xlu2 %v972_v32  ;;  %v2388_v32 = vld [vmem:[#allocation5_spill] sm:$0xff] }
 0x339   : > { %v986_v26 = vcvt.s32.f32 %v843_v44 }
 0x33b   : > { %1249 = vrot.lane.b32.xlu0 %v1082_v10, %s1486_s19  ;;  %v1002_v56 = vsel %vm979_vm6, %v986_v26, %v1834_v9  ;;  %v931_v10 = vcvt.f32.s32 %v2122_v61 }
 0x33c   : > { %v854_v5 = vpop.xlane.xlu1 %853  ;;  %v1083_v8 = vsel %vm1012_vm7, %v1873_v22, %v1002_v56 }
 0x33d   : > { %v855_v45 = vcvt.f32.s32 %v854_v5  ;;  %v1132_v63 = vpack.c.bf16 %v1083_v8, %v1083_v8  ;;  %v932_v49 = vshll.u32 %v931_v10, 16  ;;  %v946_v5 = vcvt.f32.s32 %v2127_v0 }
 0x33f   : > { %v858_v4 = vadd.s32 %v857_v17, %v855_v45  ;;  %v947_v45 = vshll.u32 %v946_v5, 16 }
 0x341   : > { %v987_v2 = vcvt.s32.f32 %v858_v4  ;;  %v961_v4 = vcvt.f32.s32 %v2139_v13 }
 0x343   : > { %1170 = vrot.lane.b32.xlu0 %v1132_v63, %s1487_s20  ;;  %v1003_v20 = vsel %vm979_vm6, %v987_v2, %v1839_v29  ;;  %v962_v63 = vshll.u32 %v961_v4, 16 }
 0x344   : > { %v869_v31 = vpop.xlane.xlu0 %868  ;;  %v1084_v9 = vsel %vm1012_vm7, %v1867_v41, %v1003_v20 }
 0x345   : > { %v870_v21 = vcvt.f32.s32 %v869_v31  ;;  %1253 = vrot.lane.b32.xlu1 %v1084_v9, %s1486_s19  ;;  %v1133_v35 = vpack.c.bf16 %v1084_v9, %v1084_v9 }
 0x347   : > { %v873_v22 = vadd.s32 %v872_v28, %v870_v21  ;;  %v2389_v21 = vld [vmem:[#allocation4_spill] sm:$0xff] }
 0x349   : > { %v988_v48 = vcvt.s32.f32 %v873_v22  ;;  %v2390_v22 = vld [vmem:[#allocation6_spill] sm:$0xff] }
 0x34b   : > { %v1004_v54 = vsel %vm979_vm6, %v988_v48, %v1844_v18  ;;  %v901_v18 = vcvt.f32.s32 %v2112_v37  ;;  %v916_v37 = vcvt.f32.s32 %v2117_v12  ;;  %v2391_v48 = vld [vmem:[#allocation9_spill] sm:$0xff] }
 0x34c   : > { %v884_v59 = vpop.xlane.xlu2 %883  ;;  %v1085_v29 = vsel %vm1012_vm7, %v1909_v1, %v1004_v54 }
 0x34d   : > { %v885_v43 = vcvt.f32.s32 %v884_v59  ;;  %v1134_v41 = vpack.c.bf16 %v1085_v29, %v1085_v29  ;;  %1255 = vrot.lane.b32.xlu0 %v1085_v29, %s1486_s19  ;;  %v902_v58 = vshll.u32 %v901_v18, 16  ;;  %v917_v23 = vshll.u32 %v916_v37, 16  ;;  %v2392_v29 = vld [vmem:[#allocation3_spill] sm:$0xff] }
 0x34f   : > { %v888_v42 = vadd.s32 %v887_v51, %v885_v43  ;;  %1174 = vrot.lane.b32.xlu1 %v1134_v41, %s1487_s20 }
 0x350   : > { %1160 = vrot.lane.b32.xlu2 %v1127_v62, %s1487_s20 }
 0x351   : > { %v989_v34 = vcvt.s32.f32 %v888_v42 }
 0x353   : > { %v1005_v1 = vsel %vm979_vm6, %v989_v34, %v1849_v33 }
 0x354   : > { %v899_v55 = vpop.xlane.xlu1 %898  ;;  %v1086_v47 = vsel %vm1012_vm7, %v1884_v52, %v1005_v1  ;;  %v976_v1 = vcvt.f32.s32 %v2161_v57 }
 0x355   : > { %v900_v6 = vcvt.f32.s32 %v899_v55  ;;  %v1135_v39 = vpack.c.bf16 %v1086_v47, %v1086_v47 }
 0x357   : > { %v903_v7 = vadd.s32 %v902_v58, %v900_v6  ;;  %1176 = vrot.lane.b32.xlu0 %v1135_v39, %s1487_s20  ;;  %v977_v58 = vshll.u32 %v976_v1, 16 }
 0x358   : > { %1245 = vrot.lane.b32.xlu2 %v1080_v50, %s1486_s19 }
 0x359   : > { %v990_v53 = vcvt.s32.f32 %v903_v7 }
 0x35b   : > { %v1006_v33 = vsel %vm979_vm6, %v990_v53, %v1858_v36  ;;  %v2393_v53 = vld [vmem:[#allocation8_spill] sm:$0xff] }
 0x35c   : > { %v914_v11 = vpop.xlane.xlu0 %913  ;;  %v1087_v52 = vsel %vm1012_vm7, %v1875_v46, %v1006_v33 }
 0x35d   : > { %v915_v24 = vcvt.f32.s32 %v914_v11  ;;  %1259 = vrot.lane.b32.xlu1 %v1087_v52, %s1486_s19  ;;  %v2394_v11 = vld [vmem:[#allocation7_spill] sm:$0xff] }
 0x35f   : > { %v918_v50 = vadd.s32 %v917_v23, %v915_v24 }
 0x360   : > { %1166 = vrot.lane.b32.xlu2 %v1130_v38, %s1487_s20 }
 0x361   : > { %v991_v12 = vcvt.s32.f32 %v918_v50 }
 0x363   : > { %v1007_v36 = vsel %vm979_vm6, %v991_v12, %v1865_v40  ;;  %v2387_v40 = vld [vmem:[#allocation2_spill] sm:$0xff] }
 0x364   : > { %v1088_v46 = vsel %vm1012_vm7, %v1928_v25, %v1007_v36 }
 0x365   : > { %v1137_v16 = vpack.c.bf16 %v1088_v46, %v1088_v46  ;;  %1261 = vrot.lane.b32.xlu0 %v1088_v46, %s1486_s19 }
 0x367   : > { %1180 = vrot.lane.b32.xlu1 %v1137_v16, %s1487_s20 }
 0x368   : > { %1251 = vrot.lane.b32.xlu2 %v1083_v8, %s1486_s19  ;;  %v1136_v8 = vpack.c.bf16 %v1087_v52, %v1087_v52 }
 0x36a   : > { %v929_v19 = vpop.xlane.xlu2 %928 }
 0x36b   : > { %v930_v27 = vcvt.f32.s32 %v929_v19 }
 0x36d   : > { %v933_v3 = vadd.s32 %v932_v49, %v930_v27 }
 0x36f   : > { %v992_v44 = vcvt.s32.f32 %v933_v3 }
 0x370   : > { %1172 = vrot.lane.b32.xlu2 %v1133_v35, %s1487_s20 }
 0x371   : > { %v1008_v25 = vsel %vm979_vm6, %v992_v44, %v2387_v40 }
 0x372   : > { %v1240_v61 = vpop.permute.xlu2 %1239  ;;  %v1089_v14 = vsel %vm1012_vm7, %v2388_v32, %v1008_v25  ;;  %v944_v56 = vpop.xlane.xlu1 %943 }
 0x373   : > { %1287 = vst.msk [vmem:[%s2265_s23] sm:$0xff] %vm215_vm0, %v1240_v61  ;;  %v1138_v26 = vpack.c.bf16 %v1089_v14, %v1089_v14  ;;  %v945_v17 = vcvt.f32.s32 %v944_v56 }
 0x375   : > { %1182 = vrot.lane.b32.xlu0 %v1138_v26, %s1487_s20  ;;  %v948_v15 = vadd.s32 %v947_v45, %v945_v17 }
 0x377   : > { %v993_v31 = vcvt.s32.f32 %v948_v15 }
 0x378   : > { %1257 = vrot.lane.b32.xlu2 %v1086_v47, %s1486_s19 }
 0x379   : > { %v1009_v0 = vsel %vm979_vm6, %v993_v31, %v2389_v21 }
 0x37a   : > { %v1090_v51 = vsel %vm1012_vm7, %v2392_v29, %v1009_v0 }
 0x37b   : > { %v1139_v43 = vpack.c.bf16 %v1090_v51, %v1090_v51 }
 0x380   : > { %1178 = vrot.lane.b32.xlu2 %v1136_v8, %s1487_s20 }
 0x382   : > { %v959_v2 = vpop.xlane.xlu0 %958 }
 0x383   : > { %v960_v20 = vcvt.f32.s32 %v959_v2 }
 0x385   : > { %v963_v9 = vadd.s32 %v962_v63, %v960_v20 }
 0x387   : > { %v994_v28 = vcvt.s32.f32 %v963_v9 }
 0x388   : > { %1263 = vrot.lane.b32.xlu2 %v1089_v14, %s1486_s19 }
 0x389   : > { %v1010_v13 = vsel %vm979_vm6, %v994_v28, %v2390_v22 }
 0x38a   : > { %v1242_v30 = vpop.permute.xlu1 %1241  ;;  %v1091_v54 = vsel %vm1012_vm7, %v2391_v48, %v1010_v13 }
 0x38b   : > { %1288 = vst.msk [vmem:[%s2265_s23 + $0x8] sm:$0xff] %vm215_vm0, %v1242_v30  ;;  %v1140_v59 = vpack.c.bf16 %v1091_v54, %v1091_v54 }
 0x38d   : > { %1186 = vrot.lane.b32.xlu1 %v1140_v59, %s1487_s20 }
 0x390   : > { %1184 = vrot.lane.b32.xlu2 %v1139_v43, %s1487_s20 }
 0x392   : > { %v1163_v41 = vpop.permute.xlu1 %1162 }
 0x393   : > { %1209 = vst.msk [vmem:[%s1634_s7 + $0x8] sm:$0xf] %vm1206_vm5, %v1163_v41 }
 0x395   : > { %1265 = vrot.lane.b32.xlu1 %v1090_v51, %s1486_s19  ;;  %v1159_v62 = vpop.permute.xlu0 %1158 }
 0x396   : > { %1207 = vst.msk [vmem:[%s1634_s7] sm:$0xf] %vm1206_vm5, %v1159_v62 }
 0x39d   : > { %v1244_v42 = vpop.permute.xlu0 %1243 }
 0x39e   : > { %1289 = vst.msk [vmem:[%s2265_s23 + $0x10] sm:$0xff] %vm215_vm0, %v1244_v42 }
 0x39f   : > { %v1248_v18 = vpop.permute.xlu1 %1247 }
 0x3a0   : > { %1291 = vst.msk [vmem:[%s2265_s23 + $0x20] sm:$0xff] %vm215_vm0, %v1248_v18 }
 0x3a5   : > { %v1165_v34 = vpop.permute.xlu0 %1164 }
 0x3a6   : > { %1210 = vst.msk [vmem:[%s1634_s7 + $0xc] sm:$0xf] %vm1206_vm5, %v1165_v34 }
 0x3a9   : > { %v1169_v55 = vpop.permute.xlu1 %1168 }
 0x3aa   : > { %1212 = vst.msk [vmem:[%s1634_s7 + $0x14] sm:$0xf] %vm1206_vm5, %v1169_v55 }
 0x3ab   : > { %v974_v47 = vpop.xlane.xlu2 %973 }
 0x3ac   : > { %v975_v6 = vcvt.f32.s32 %v974_v47 }
 0x3ad   : > { %v1250_v39 = vpop.permute.xlu0 %1249 }
 0x3ae   : > { %v978_v7 = vadd.s32 %v977_v58, %v975_v6  ;;  %1292 = vst.msk [vmem:[%s2265_s23 + $0x28] sm:$0xff] %vm215_vm0, %v1250_v39 }
 0x3b0   : > { %v995_v37 = vcvt.s32.f32 %v978_v7 }
 0x3b2   : > { %v1011_v33 = vsel %vm979_vm6, %v995_v37, %v2393_v53 }
 0x3b3   : > { %v1161_v57 = vpop.permute.xlu2 %1160  ;;  %v1092_v52 = vsel %vm1012_vm7, %v2394_v11, %v1011_v33 }
 0x3b4   : > { %1208 = vst.msk [vmem:[%s1634_s7 + $0x4] sm:$0xf] %vm1206_vm5, %v1161_v57  ;;  %1269 = vrot.lane.b32.xlu2 %v1092_v52, %s1486_s19  ;;  %v1141_v23 = vpack.c.bf16 %v1092_v52, %v1092_v52 }
 0x3b5   : > { %v1171_v24 = vpop.permute.xlu0 %1170 }
 0x3b6   : > { %1213 = vst.msk [vmem:[%s1634_s7 + $0x18] sm:$0xf] %vm1206_vm5, %v1171_v24  ;;  %1188 = vrot.lane.b32.xlu0 %v1141_v23, %s1487_s20 }
 0x3b7   : > { %v1254_v38 = vpop.permute.xlu1 %1253 }
 0x3b8   : > { %1294 = vst.msk [vmem:[%s2265_s23 + $0x38] sm:$0xff] %vm215_vm0, %v1254_v38 }
 0x3bb   : > { %v1246_v60 = vpop.permute.xlu2 %1245 }
 0x3bc   : > { %1290 = vst.msk [vmem:[%s2265_s23 + $0x18] sm:$0xff] %vm215_vm0, %v1246_v60 }
 0x3be   : > { %1267 = vrot.lane.b32.xlu0 %v1091_v54, %s1486_s19 }
 0x3bf   : > { %v1256_v50 = vpop.permute.xlu0 %1255 }
 0x3c0   : > { %1295 = vst.msk [vmem:[%s2265_s23 + $0x40] sm:$0xff] %vm215_vm0, %v1256_v50 }
 0x3c1   : > { %v1175_v12 = vpop.permute.xlu1 %1174 }
 0x3c2   : > { %1215 = vst.msk [vmem:[%s1634_s7 + $0x20] sm:$0xf] %vm1206_vm5, %v1175_v12 }
 0x3c3   : > { %v1167_v36 = vpop.permute.xlu2 %1166 }
 0x3c4   : > { %1211 = vst.msk [vmem:[%s1634_s7 + $0x10] sm:$0xf] %vm1206_vm5, %v1167_v36 }
 0x3c9   : > { %v1177_v46 = vpop.permute.xlu0 %1176 }
 0x3ca   : > { %1216 = vst.msk [vmem:[%s1634_s7 + $0x24] sm:$0xf] %vm1206_vm5, %v1177_v46 }
 0x3cb   : > { %v1252_v16 = vpop.permute.xlu2 %1251 }
 0x3cc   : > { %1293 = vst.msk [vmem:[%s2265_s23 + $0x30] sm:$0xff] %vm215_vm0, %v1252_v16 }
 0x3cf   : > { %v1260_v10 = vpop.permute.xlu1 %1259 }
 0x3d0   : > { %1297 = vst.msk [vmem:[%s2265_s23 + $0x50] sm:$0xff] %vm215_vm0, %v1260_v10 }
 0x3d3   : > { %v1173_v19 = vpop.permute.xlu2 %1172 }
 0x3d4   : > { %1214 = vst.msk [vmem:[%s1634_s7 + $0x1c] sm:$0xf] %vm1206_vm5, %v1173_v19 }
 0x3d7   : > { %v1262_v49 = vpop.permute.xlu0 %1261 }
 0x3d8   : > { %1298 = vst.msk [vmem:[%s2265_s23 + $0x58] sm:$0xff] %vm215_vm0, %v1262_v49 }
 0x3d9   : > { %v1181_v27 = vpop.permute.xlu1 %1180 }
 0x3da   : > { %1218 = vst.msk [vmem:[%s1634_s7 + $0x2c] sm:$0xf] %vm1206_vm5, %v1181_v27 }
 0x3db   : > { %v1258_v3 = vpop.permute.xlu2 %1257 }
 0x3dc   : > { %1296 = vst.msk [vmem:[%s2265_s23 + $0x48] sm:$0xff] %vm215_vm0, %v1258_v3 }
 0x3e3   : > { %v1179_v35 = vpop.permute.xlu2 %1178 }
 0x3e4   : > { %1217 = vst.msk [vmem:[%s1634_s7 + $0x28] sm:$0xf] %vm1206_vm5, %v1179_v35 }
 0x3e7   : > { %v1183_v44 = vpop.permute.xlu0 %1182 }
 0x3e8   : > { %1219 = vst.msk [vmem:[%s1634_s7 + $0x30] sm:$0xf] %vm1206_vm5, %v1183_v44 }
 0x3eb   : > { %v1264_v40 = vpop.permute.xlu2 %1263 }
 0x3ec   : > { %1299 = vst.msk [vmem:[%s2265_s23 + $0x60] sm:$0xff] %vm215_vm0, %v1264_v40 }
 0x3f3   : > { %v1185_v25 = vpop.permute.xlu2 %1184 }
 0x3f4   : > { %1220 = vst.msk [vmem:[%s1634_s7 + $0x34] sm:$0xf] %vm1206_vm5, %v1185_v25 }
 0x3ff   : > { %v1187_v61 = vpop.permute.xlu1 %1186 }
 0x400   : > { %1221 = vst.msk [vmem:[%s1634_s7 + $0x38] sm:$0xf] %vm1206_vm5, %v1187_v61 }
 0x407   : > { %v1266_v32 = vpop.permute.xlu1 %1265 }
 0x408   : > { %1300 = vst.msk [vmem:[%s2265_s23 + $0x68] sm:$0xff] %vm215_vm0, %v1266_v32 }
 0x40e   : > { %v1270_v14 = vpop.permute.xlu2 %1269 }
 0x40f   : > { %1302 = vst.msk [vmem:[%s2265_s23 + $0x78] sm:$0xff] %vm215_vm0, %v1270_v14 }
 0x428   : > { %v1189_v26 = vpop.permute.xlu0 %1188 }
 0x429   : > { %1222 = vst.msk [vmem:[%s1634_s7 + $0x3c] sm:$0xf] %vm1206_vm5, %v1189_v26 }
 0x430   : > { %v1268_v56 = vpop.permute.xlu0 %1267 }
 0x431   : > { %1301 = vst.msk [vmem:[%s2265_s23 + $0x70] sm:$0xff] %vm215_vm0, %v1268_v56 }
 0x432 PF: > { %s14_s12 = sadd.s32 1, %s1483_s12  }
 0x433   : > { %p11_p4 = scmp.ge.s32.totalorder %s14_s12, 4  }
 0x435   :  { %13 = sbr.rel (!%p11_p4) target bundleno = 1 (0x1), region = 70 }

</bundles_post_ra>
